<compile_context>
chip_gen: v7x
topology: tpu7x:2x2x1
jax: 0.10.0
libtpu: 0.0.40
codegen_flags: <defaults>
</compile_context>

<pallas_src>
import numpy as np
import jax
import jax.numpy as jnp
from jax.experimental import pallas as pl
from jax.experimental.pallas import tpu as pltpu

TM_MAX = 1024         # row-tile upper bound (sweepable)
LANE = 128            # all MLP widths padded to a multiple of this -> lane-dense stores
LEAKY_SLOPE = 0.2


def _round_up(x, m):
    return ((x + m - 1) // m) * m


# ----------------------------------------------------------------------------
# Pallas kernel: fused (multi-branch) Linear(+LeakyReLU) stack with optional
# sigmoid-gated epilogue.  All weight/bias/mask blocks are full-array blocks
# with a constant index map; activations are tiled along rows.
# ----------------------------------------------------------------------------
def _make_fused_mlp_kernel(n_inputs, meta):
    """meta: tuple of (x_idx, n_layers, gate_mode); gate_mode in (None,'full','mask')."""
    n_out = len(meta)

    def kernel(*refs):
        x_refs = refs[:n_inputs]
        out_refs = refs[len(refs) - n_out:]
        p = n_inputs
        for bi, (x_idx, n_layers, gate_mode) in enumerate(meta):
            h = x_refs[x_idx][...].astype(jnp.float32)
            for l in range(n_layers):
                w = refs[p][...]          # bf16 [d_in_pad, d_out_pad]
                b = refs[p + 1][...]      # f32  [1, d_out_pad]
                p += 2
                # bf16 MXU inputs (K and N both 128-aligned), f32 accumulation.
                h = jnp.dot(h.astype(jnp.bfloat16), w,
                            preferred_element_type=jnp.float32) + b
                if l < n_layers - 1:
                    # LeakyReLU(0.2) in max-form: 2 VALU ops instead of cmp+sel+mul.
                    h = jnp.maximum(h, LEAKY_SLOPE * h)
            if gate_mode is not None:
                # k = sigmoid(y[:, 0]); divide goes to the EUP slot (approx reciprocal).
                k = pl.reciprocal(1.0 + jnp.exp(-h[:, 0:1]), approx=True)
                if gate_mode == "full":
                    # Every downstream-consumed column is gated; column 0 and the zero
                    # padding columns are never read, so gate the whole tile (no mask).
                    h = h * k
                else:  # "mask": precomputed 0/1 column mask follows the weight refs.
                    m = refs[p][...]      # f32 [1, d_out_pad]
                    p += 1
                    h = jnp.where(m > 0.5, h * k, h)
            out_refs[bi][...] = h

    return kernel


def fused_mlp_forward(xs, branches):
    """Run one or more MLP branches in a single pallas_call.

    xs:        list of [M, d_in_i] float arrays (all with the same row count M).
    branches:  list of dicts {"x": input index, "mlp": init_mlp(...) dict,
                              "gate": None or ("full"|"mask", start, stop)}.
    Returns a list of [M, d_out_real] float32 arrays (real columns sliced off the
    lane-padded kernel outputs).
    """
    M = xs[0].shape[0]
    for x in xs:
        assert x.shape[0] == M

    # Balanced row tiles: never append a near-all-padding trailing tile, and keep the
    # grid >= 2 steps whenever there is enough work so v7x's 2 TCs both get a share.
    mp8 = _round_up(max(M, 1), 8)
    n_blocks = (mp8 + TM_MAX - 1) // TM_MAX
    if mp8 > 64:
        n_blocks = max(n_blocks, 2)
    tm = _round_up((mp8 + n_blocks - 1) // n_blocks, 16)  # 16 = bf16 MXU sublane tile
    mp = tm * n_blocks

    args = []
    in_specs = []
    for x in xs:
        d = x.shape[1]
        dp = _round_up(d, LANE)       # lane-pad first-layer K -> unmasked operand loads
        xp = jnp.pad(x.astype(jnp.float32), ((0, mp - M), (0, dp - d)))
        args.append(xp)
        in_specs.append(pl.BlockSpec((tm, dp), lambda i: (i, 0)))

    meta = []
    out_shapes = []
    out_specs = []
    for br in branches:
        layers = br["mlp"]["layers"]
        for (w, b) in layers:
            args.append(w)
            in_specs.append(pl.BlockSpec(w.shape, lambda i: (0, 0)))
            args.append(b)
            in_specs.append(pl.BlockSpec(b.shape, lambda i: (0, 0)))
        d_out_pad = layers[-1][0].shape[1]
        gate = br.get("gate")
        gate_mode = None
        if gate is not None:
            gate_mode, gs, ge = gate
            if gate_mode == "mask":
                m = np.zeros((1, d_out_pad), np.float32)
                m[0, gs:ge] = 1.0
                args.append(jnp.asarray(m))
                in_specs.append(pl.BlockSpec((1, d_out_pad), lambda i: (0, 0)))
        out_shapes.append(jax.ShapeDtypeStruct((mp, d_out_pad), jnp.float32))
        out_specs.append(pl.BlockSpec((tm, d_out_pad), lambda i: (i, 0)))
        meta.append((br["x"], len(layers), gate_mode))

    kernel = _make_fused_mlp_kernel(len(xs), tuple(meta))
    cparams = pltpu.CompilerParams(dimension_semantics=("parallel",),
                                   vmem_limit_bytes=32 * 1024 * 1024)

    if len(branches) == 1:
        out = pl.pallas_call(
            kernel,
            out_shape=out_shapes[0],
            grid=(n_blocks,),
            in_specs=in_specs,
            out_specs=out_specs[0],
            compiler_params=cparams,
        )(*args)
        outs = [out]
    else:
        outs = list(pl.pallas_call(
            kernel,
            out_shape=tuple(out_shapes),
            grid=(n_blocks,),
            in_specs=in_specs,
            out_specs=tuple(out_specs),
            compiler_params=cparams,
        )(*args))

    return [outs[i][:M, :branches[i]["mlp"]["d_out"]] for i in range(len(branches))]


def mlp_forward(x, mlp, gate=None):
    return fused_mlp_forward([x], [{"x": 0, "mlp": mlp, "gate": gate}])[0]


# ----------------------------------------------------------------------------
# Deterministic parameter init (torch.nn.Linear-style uniform bounds), with ALL
# in/out widths zero-padded to a multiple of 128 (exact: padded weight rows see
# zero activations, padded columns stay zero through bias/LeakyReLU/gate).
# Weights are stored bf16 (MXU-native), biases f32.
# ----------------------------------------------------------------------------
def init_mlp(key, sizes):
    layers = []
    for i in range(1, len(sizes)):
        fan_in, fan_out = sizes[i - 1], sizes[i]
        in_dim = _round_up(fan_in, LANE)
        out_dim = _round_up(fan_out, LANE)
        key, k1, k2 = jax.random.split(key, 3)
        bound = 1.0 / np.sqrt(fan_in)
        w = jax.random.uniform(k1, (fan_in, fan_out), jnp.float32, -bound, bound)
        b = jax.random.uniform(k2, (fan_out,), jnp.float32, -bound, bound)
        wp = jnp.zeros((in_dim, out_dim), jnp.float32).at[:fan_in, :fan_out].set(w)
        bp = jnp.zeros((1, out_dim), jnp.float32).at[0, :fan_out].set(b)
        layers.append((wp.astype(jnp.bfloat16), bp))
    return {"layers": layers, "d_out": sizes[-1]}


def init_netconv(key, in_nf, in_ef, out_nf, h1=32, h2=32):
    k1, k2, k3 = jax.random.split(key, 3)
    return {
        "msg_i2o": init_mlp(k1, (in_nf * 2 + in_ef, 64, 64, 64, 1 + h1 + h2)),
        "reduce_o": init_mlp(k2, (in_nf + h1 + h2, 64, 64, 64, out_nf)),
        "msg_o2i": init_mlp(k3, (in_nf * 2 + in_ef, 64, 64, 64, 64, out_nf)),
    }


def init_signalprop(key, in_nf, num_luts, lut_sz, out_nf, out_cef, h1=32, h2=32, lut_dup=4):
    k1, k2, k3, k4, k5 = jax.random.split(key, 5)
    return {
        "netprop": init_mlp(k1, (out_nf + 2 * in_nf, 64, 64, 64, 64, out_nf)),
        "lut_query": init_mlp(k2, (out_nf + 2 * in_nf, 64, 64, 64, num_luts * lut_dup * 2)),
        "lut_attention": init_mlp(k3, (2 + 1 + lut_sz * 2, 64, 64, 64, lut_sz * 2)),
        "cellarc_msg": init_mlp(k4, (out_nf + 2 * in_nf + num_luts * lut_dup, 64, 64, 64, 1 + h1 + h2 + out_cef)),
        "cellreduce": init_mlp(k5, (in_nf + h1 + h2, 64, 64, 64, out_nf)),
    }


# ----------------------------------------------------------------------------
# Graph message passing (glue: gather / segment scatter-reduce in plain JAX).
# TODO(synk): data-dependent segment sum/max scatters and the row gathers feeding
# the MLPs stay in plain JAX; for production-size graphs they could move in-kernel
# via PrefetchScalarGridSpec + manual DMA gather to kill the HBM round trip of the
# (E, 2*nf+ef) edge matrices.
# ----------------------------------------------------------------------------
def _segment_sum(vals, idx, n):
    return jnp.zeros((n, vals.shape[1]), jnp.float32).at[idx].add(vals)


def _segment_max(vals, idx, n):
    out = jnp.full((n, vals.shape[1]), -jnp.inf, jnp.float32).at[idx].max(vals)
    deg = jnp.zeros((n,), jnp.float32).at[idx].add(1.0)
    return jnp.where((deg > 0)[:, None], out, 0.0)  # DGL fills zero-degree with 0


def netconv_forward(params, g, nf, out_nf, h1=32, h2=32):
    N = nf.shape[0]
    src, dst = g["net_src"], g["net_dst"]
    # Both message MLPs consume permutations of the same gathered rows -> one launch.
    x_o2i = jnp.concatenate([nf[src], nf[dst], g["ef_net_out"]], axis=1)
    x_i2o = jnp.concatenate([nf[dst], nf[src], g["ef_net_in"]], axis=1)
    efi, y = fused_mlp_forward(
        [x_o2i, x_i2o],
        [{"x": 0, "mlp": params["msg_o2i"], "gate": None},
         {"x": 1, "mlp": params["msg_i2o"], "gate": ("full", 1, 1 + h1 + h2)}])
    # update_all over 'net_out': sum of msg_o2i messages at destinations
    new_nf = _segment_sum(efi, dst, N)
    # 'net_in' gated messages (sigmoid gate already applied in-kernel)
    efo1 = y[:, 1:1 + h1]
    efo2 = y[:, 1 + h1:1 + h1 + h2]
    nfo1 = _segment_sum(efo1, src, N)   # dst of net_in edge == net_src
    nfo2 = _segment_max(efo2, src, N)
    # apply_nodes on output nodes
    on = g["output_nodes"]
    xo = jnp.concatenate([nf[on], nfo1[on], nfo2[on]], axis=1)
    new_nf = new_nf.at[on].set(mlp_forward(xo, params["reduce_o"]))
    return new_nf


def signalprop_forward(params, g, nf, out_nf=8, out_cef=4, h1=32, h2=32,
                       num_luts=8, lut_sz=7, lut_dup=4):
    N = nf.shape[0]
    new_nf = jnp.zeros((N, out_nf), jnp.float32)
    pi = g["pi_nodes"]
    new_nf = new_nf.at[pi].set(
        jnp.concatenate([g["n_ats"][pi], g["n_slew_log"][pi]], axis=1))
    efce_all = jnp.zeros((g["cell_src"].shape[0], out_cef), jnp.float32)

    topo = g["topo"]
    assert len(topo) % 2 == 0
    axis_len = num_luts * (1 + 2 * lut_sz)
    tables_len = num_luts * lut_sz * lut_sz

    for i in range(1, len(topo)):
        nodes = topo[i]
        if i % 2 == 1:  # net propagation level (pull + sum)
            eidx = g["level_net_edges"][i]
            src = g["net_src"][eidx]
            dstn = g["net_dst"][eidx]
            x = jnp.concatenate([new_nf[src], nf[src], nf[dstn]], axis=1)
            efn = mlp_forward(x, params["netprop"])
            agg = _segment_sum(efn, dstn, N)
            new_nf = new_nf.at[nodes].set(agg[nodes])
        else:  # cell-arc propagation level
            eidx = g["level_cell_edges"][i]
            src = g["cell_src"][eidx]
            dstn = g["cell_dst"][eidx]
            ef = g["ef_cell"][eidx]
            Ec = src.shape[0]
            last_nf = new_nf[src]
            q_in = jnp.concatenate([last_nf, nf[src], nf[dstn]], axis=1)
            q = mlp_forward(q_in, params["lut_query"])                  # (Ec, 64)
            q2 = q.reshape(Ec * num_luts * lut_dup, 2)
            # broadcast (instead of repeat) the per-LUT axis rows across lut_dup
            axis = ef[:, :axis_len].reshape(Ec, num_luts, 1, 1 + 2 * lut_sz)
            axis = jnp.broadcast_to(axis, (Ec, num_luts, lut_dup, 1 + 2 * lut_sz))
            axis = axis.reshape(Ec * num_luts * lut_dup, 1 + 2 * lut_sz)
            a = mlp_forward(jnp.concatenate([q2, axis], axis=1),
                            params["lut_attention"])                    # (Ec*32, 14)
            # TODO(synk): outer-product + table contraction could be folded into the
            # lut_attention kernel epilogue; kept in JAX (small VPU work) for clarity.
            a = a.reshape(Ec * num_luts * lut_dup, 2, lut_sz)
            ax, ay = a[:, 0, :], a[:, 1, :]
            outer = (ax[:, :, None] * ay[:, None, :]).reshape(
                Ec, num_luts, lut_dup, lut_sz * lut_sz)
            tables = ef[:, axis_len:axis_len + tables_len].reshape(
                Ec, num_luts, 1, lut_sz * lut_sz)
            r = jnp.sum(tables * outer, axis=-1).reshape(Ec, num_luts * lut_dup)
            x = jnp.concatenate([last_nf, nf[src], nf[dstn], r], axis=1)
            y = mlp_forward(x, params["cellarc_msg"],
                            gate=("mask", 1, 1 + h1 + h2))   # gated in-kernel, cef ungated
            efc1 = y[:, 1:1 + h1]
            efc2 = y[:, 1 + h1:1 + h1 + h2]
            cef = y[:, 1 + h1 + h2:1 + h1 + h2 + out_cef]
            efce_all = efce_all.at[eidx].set(cef)
            nfc1 = _segment_sum(efc1, dstn, N)
            nfc2 = _segment_max(efc2, dstn, N)
            xo = jnp.concatenate([nf[nodes], nfc1[nodes], nfc2[nodes]], axis=1)
            new_nf = new_nf.at[nodes].set(mlp_forward(xo, params["cellreduce"]))
    return new_nf, efce_all


def timing_gcn_forward(params, g):
    nf0 = g["nf"]                                   # (N, 10)
    x = netconv_forward(params["nc1"], g, nf0, out_nf=32)
    x = netconv_forward(params["nc2"], g, x, out_nf=32)
    x = netconv_forward(params["nc3"], g, x, out_nf=16)
    net_delays = x[:, :4]
    nf1 = jnp.concatenate([nf0, x], axis=1)         # (N, 26)
    nf2, cell_delays = signalprop_forward(params["prop"], g, nf1)
    at = nf2[:, :4]
    slew = nf2[:, 4:]
    return net_delays, cell_delays, at, slew


# ----------------------------------------------------------------------------
# Synthetic deterministic graph + parameters.
# ----------------------------------------------------------------------------
def build_graph(key):
    # Pin levels: L0 = primary inputs (drivers), L1 = cell input pins,
    #             L2 = cell output pins (drivers), L3 = cell input pins.
    L0 = np.arange(0, 4)
    L1 = np.arange(4, 12)
    L2 = np.arange(12, 16)
    L3 = np.arange(16, 22)
    N = 22
    # net_out edges: driver -> sink ; net_in = reverse
    net_src = np.concatenate([L0[(L1 - 4) % 4], L2[(L3 - 16) % 4]]).astype(np.int32)
    net_dst = np.concatenate([L1, L3]).astype(np.int32)
    # cell_out edges: cell input pin -> cell output pin (2 arcs per output)
    cell_src = L1.astype(np.int32)
    cell_dst = np.repeat(L2, 2).astype(np.int32)

    ks = jax.random.split(key, 6)
    g = {
        "nf": jax.random.normal(ks[0], (N, 10), jnp.float32),
        "n_ats": jax.random.normal(ks[1], (N, 4), jnp.float32),
        "n_slew_log": jax.random.normal(ks[2], (N, 4), jnp.float32),
        "ef_net_out": jax.random.normal(ks[3], (net_src.shape[0], 2), jnp.float32),
        "ef_net_in": jax.random.normal(ks[4], (net_src.shape[0], 2), jnp.float32),
        "ef_cell": jax.random.normal(ks[5], (cell_src.shape[0], 512), jnp.float32) * 0.1,
        "net_src": jnp.asarray(net_src),
        "net_dst": jnp.asarray(net_dst),
        "cell_src": jnp.asarray(cell_src),
        "cell_dst": jnp.asarray(cell_dst),
        "pi_nodes": jnp.asarray(L0, jnp.int32),
        "output_nodes": jnp.asarray(np.concatenate([L0, L2]), jnp.int32),
        "topo": [jnp.asarray(L0, jnp.int32), jnp.asarray(L1, jnp.int32),
                 jnp.asarray(L2, jnp.int32), jnp.asarray(L3, jnp.int32)],
        "level_net_edges": {1: jnp.arange(0, 8, dtype=jnp.int32),
                            3: jnp.arange(8, 14, dtype=jnp.int32)},
        "level_cell_edges": {2: jnp.arange(0, 8, dtype=jnp.int32)},
    }
    return g


def build_params(key):
    k1, k2, k3, k4 = jax.random.split(key, 4)
    return {
        "nc1": init_netconv(k1, 10, 2, 32),
        "nc2": init_netconv(k2, 32, 2, 32),
        "nc3": init_netconv(k3, 32, 2, 16),
        "prop": init_signalprop(k4, 10 + 16, 8, 7, 8, 4),
    }


if __name__ == "__main__":
    key = jax.random.PRNGKey(0)
    kg, kp = jax.random.split(key)
    graph = build_graph(kg)
    params = build_params(kp)

    net_delays, cell_delays, at, slew = timing_gcn_forward(params, graph)
    jax.block_until_ready((net_delays, cell_delays, at, slew))

    assert net_delays.shape == (22, 4)
    assert cell_delays.shape == (8, 4)
    assert at.shape == (22, 4)
    assert slew.shape == (22, 4)
    assert bool(jnp.all(jnp.isfinite(net_delays)))
    assert bool(jnp.all(jnp.isfinite(cell_delays)))
    assert bool(jnp.all(jnp.isfinite(at)))
    assert bool(jnp.all(jnp.isfinite(slew)))
    print("KERNEL_OK")
</pallas_src>

<mosaic_0001>
module attributes {stable_mosaic.version = 11 : i64} {
  func.func @kernel(%arg0: i32, %arg1: memref<16x128xf32, #tpu.memory_space<vmem>>, %arg2: memref<16x128xf32, #tpu.memory_space<vmem>>, %arg3: memref<128x128xbf16, #tpu.memory_space<vmem>>, %arg4: memref<1x128xf32, #tpu.memory_space<vmem>>, %arg5: memref<128x128xbf16, #tpu.memory_space<vmem>>, %arg6: memref<1x128xf32, #tpu.memory_space<vmem>>, %arg7: memref<128x128xbf16, #tpu.memory_space<vmem>>, %arg8: memref<1x128xf32, #tpu.memory_space<vmem>>, %arg9: memref<128x128xbf16, #tpu.memory_space<vmem>>, %arg10: memref<1x128xf32, #tpu.memory_space<vmem>>, %arg11: memref<128x128xbf16, #tpu.memory_space<vmem>>, %arg12: memref<1x128xf32, #tpu.memory_space<vmem>>, %arg13: memref<128x128xbf16, #tpu.memory_space<vmem>>, %arg14: memref<1x128xf32, #tpu.memory_space<vmem>>, %arg15: memref<128x128xbf16, #tpu.memory_space<vmem>>, %arg16: memref<1x128xf32, #tpu.memory_space<vmem>>, %arg17: memref<128x128xbf16, #tpu.memory_space<vmem>>, %arg18: memref<1x128xf32, #tpu.memory_space<vmem>>, %arg19: memref<128x128xbf16, #tpu.memory_space<vmem>>, %arg20: memref<1x128xf32, #tpu.memory_space<vmem>>, %arg21: memref<16x128xf32, #tpu.memory_space<vmem>>, %arg22: memref<16x128xf32, #tpu.memory_space<vmem>>) attributes {dimension_semantics = [#tpu.dimension_semantics<parallel>], iteration_bounds = array<i64: 1>, scalar_prefetch = 0 : i64, scratch_operands = 0 : i64, tpu.core_type = #tpu.core_type<tc>, window_params = [{transform_indices = @transform_0, window_bounds = array<i64: 16, 128>}, {transform_indices = @transform_1, window_bounds = array<i64: 16, 128>}, {pipeline_mode = #tpu.pipeline_mode<synchronous>, transform_indices = @transform_2, window_bounds = array<i64: 128, 128>}, {pipeline_mode = #tpu.pipeline_mode<synchronous>, transform_indices = @transform_3, window_bounds = array<i64: 1, 128>}, {pipeline_mode = #tpu.pipeline_mode<synchronous>, transform_indices = @transform_4, window_bounds = array<i64: 128, 128>}, {pipeline_mode = #tpu.pipeline_mode<synchronous>, transform_indices = @transform_5, window_bounds = array<i64: 1, 128>}, {pipeline_mode = #tpu.pipeline_mode<synchronous>, transform_indices = @transform_6, window_bounds = array<i64: 128, 128>}, {pipeline_mode = #tpu.pipeline_mode<synchronous>, transform_indices = @transform_7, window_bounds = array<i64: 1, 128>}, {pipeline_mode = #tpu.pipeline_mode<synchronous>, transform_indices = @transform_8, window_bounds = array<i64: 128, 128>}, {pipeline_mode = #tpu.pipeline_mode<synchronous>, transform_indices = @transform_9, window_bounds = array<i64: 1, 128>}, {pipeline_mode = #tpu.pipeline_mode<synchronous>, transform_indices = @transform_10, window_bounds = array<i64: 128, 128>}, {pipeline_mode = #tpu.pipeline_mode<synchronous>, transform_indices = @transform_11, window_bounds = array<i64: 1, 128>}, {pipeline_mode = #tpu.pipeline_mode<synchronous>, transform_indices = @transform_12, window_bounds = array<i64: 128, 128>}, {pipeline_mode = #tpu.pipeline_mode<synchronous>, transform_indices = @transform_13, window_bounds = array<i64: 1, 128>}, {pipeline_mode = #tpu.pipeline_mode<synchronous>, transform_indices = @transform_14, window_bounds = array<i64: 128, 128>}, {pipeline_mode = #tpu.pipeline_mode<synchronous>, transform_indices = @transform_15, window_bounds = array<i64: 1, 128>}, {pipeline_mode = #tpu.pipeline_mode<synchronous>, transform_indices = @transform_16, window_bounds = array<i64: 128, 128>}, {pipeline_mode = #tpu.pipeline_mode<synchronous>, transform_indices = @transform_17, window_bounds = array<i64: 1, 128>}, {pipeline_mode = #tpu.pipeline_mode<synchronous>, transform_indices = @transform_18, window_bounds = array<i64: 128, 128>}, {pipeline_mode = #tpu.pipeline_mode<synchronous>, transform_indices = @transform_19, window_bounds = array<i64: 1, 128>}, {transform_indices = @transform_20, window_bounds = array<i64: 16, 128>}, {transform_indices = @transform_21, window_bounds = array<i64: 16, 128>}]} {
    %c0 = arith.constant 0 : index
    %c0_0 = arith.constant 0 : index
    %0 = vector.load %arg1[%c0, %c0_0] : memref<16x128xf32, #tpu.memory_space<vmem>>, vector<16x128xf32>
    %c0_1 = arith.constant 0 : index
    %c0_2 = arith.constant 0 : index
    %1 = vector.load %arg3[%c0_1, %c0_2] : memref<128x128xbf16, #tpu.memory_space<vmem>>, vector<128x128xbf16>
    %c0_3 = arith.constant 0 : index
    %c0_4 = arith.constant 0 : index
    %2 = vector.load %arg4[%c0_3, %c0_4] : memref<1x128xf32, #tpu.memory_space<vmem>>, vector<1x128xf32>
    %3 = arith.truncf %0 : vector<16x128xf32> to vector<16x128xbf16>
    %cst = arith.constant dense<0.000000e+00> : vector<16x128xf32>
    %4 = tpu.matmul %3, %1, %cst {dimension_numbers = #tpu.dot_dimension_numbers<[1], [0], [0], [1], [0, 0, 1, 1], [], []>} : vector<16x128xbf16>, vector<128x128xbf16>, vector<16x128xf32> -> vector<16x128xf32>
    %5 = vector.broadcast %2 : vector<1x128xf32> to vector<16x128xf32>
    %6 = arith.addf %4, %5 : vector<16x128xf32>
    %cst_5 = arith.constant 2.000000e-01 : f32
    %7 = vector.broadcast %cst_5 : f32 to vector<16x128xf32>
    %8 = arith.mulf %7, %6 : vector<16x128xf32>
    %9 = arith.maximumf %6, %8 : vector<16x128xf32>
    %c0_6 = arith.constant 0 : index
    %c0_7 = arith.constant 0 : index
    %10 = vector.load %arg5[%c0_6, %c0_7] : memref<128x128xbf16, #tpu.memory_space<vmem>>, vector<128x128xbf16>
    %c0_8 = arith.constant 0 : index
    %c0_9 = arith.constant 0 : index
    %11 = vector.load %arg6[%c0_8, %c0_9] : memref<1x128xf32, #tpu.memory_space<vmem>>, vector<1x128xf32>
    %12 = arith.truncf %9 : vector<16x128xf32> to vector<16x128xbf16>
    %cst_10 = arith.constant dense<0.000000e+00> : vector<16x128xf32>
    %13 = tpu.matmul %12, %10, %cst_10 {dimension_numbers = #tpu.dot_dimension_numbers<[1], [0], [0], [1], [0, 0, 1, 1], [], []>} : vector<16x128xbf16>, vector<128x128xbf16>, vector<16x128xf32> -> vector<16x128xf32>
    %14 = vector.broadcast %11 : vector<1x128xf32> to vector<16x128xf32>
    %15 = arith.addf %13, %14 : vector<16x128xf32>
    %cst_11 = arith.constant 2.000000e-01 : f32
    %16 = vector.broadcast %cst_11 : f32 to vector<16x128xf32>
    %17 = arith.mulf %16, %15 : vector<16x128xf32>
    %18 = arith.maximumf %15, %17 : vector<16x128xf32>
    %c0_12 = arith.constant 0 : index
    %c0_13 = arith.constant 0 : index
    %19 = vector.load %arg7[%c0_12, %c0_13] : memref<128x128xbf16, #tpu.memory_space<vmem>>, vector<128x128xbf16>
    %c0_14 = arith.constant 0 : index
    %c0_15 = arith.constant 0 : index
    %20 = vector.load %arg8[%c0_14, %c0_15] : memref<1x128xf32, #tpu.memory_space<vmem>>, vector<1x128xf32>
    %21 = arith.truncf %18 : vector<16x128xf32> to vector<16x128xbf16>
    %cst_16 = arith.constant dense<0.000000e+00> : vector<16x128xf32>
    %22 = tpu.matmul %21, %19, %cst_16 {dimension_numbers = #tpu.dot_dimension_numbers<[1], [0], [0], [1], [0, 0, 1, 1], [], []>} : vector<16x128xbf16>, vector<128x128xbf16>, vector<16x128xf32> -> vector<16x128xf32>
    %23 = vector.broadcast %20 : vector<1x128xf32> to vector<16x128xf32>
    %24 = arith.addf %22, %23 : vector<16x128xf32>
    %cst_17 = arith.constant 2.000000e-01 : f32
    %25 = vector.broadcast %cst_17 : f32 to vector<16x128xf32>
    %26 = arith.mulf %25, %24 : vector<16x128xf32>
    %27 = arith.maximumf %24, %26 : vector<16x128xf32>
    %c0_18 = arith.constant 0 : index
    %c0_19 = arith.constant 0 : index
    %28 = vector.load %arg9[%c0_18, %c0_19] : memref<128x128xbf16, #tpu.memory_space<vmem>>, vector<128x128xbf16>
    %c0_20 = arith.constant 0 : index
    %c0_21 = arith.constant 0 : index
    %29 = vector.load %arg10[%c0_20, %c0_21] : memref<1x128xf32, #tpu.memory_space<vmem>>, vector<1x128xf32>
    %30 = arith.truncf %27 : vector<16x128xf32> to vector<16x128xbf16>
    %cst_22 = arith.constant dense<0.000000e+00> : vector<16x128xf32>
    %31 = tpu.matmul %30, %28, %cst_22 {dimension_numbers = #tpu.dot_dimension_numbers<[1], [0], [0], [1], [0, 0, 1, 1], [], []>} : vector<16x128xbf16>, vector<128x128xbf16>, vector<16x128xf32> -> vector<16x128xf32>
    %32 = vector.broadcast %29 : vector<1x128xf32> to vector<16x128xf32>
    %33 = arith.addf %31, %32 : vector<16x128xf32>
    %cst_23 = arith.constant 2.000000e-01 : f32
    %34 = vector.broadcast %cst_23 : f32 to vector<16x128xf32>
    %35 = arith.mulf %34, %33 : vector<16x128xf32>
    %36 = arith.maximumf %33, %35 : vector<16x128xf32>
    %c0_24 = arith.constant 0 : index
    %c0_25 = arith.constant 0 : index
    %37 = vector.load %arg11[%c0_24, %c0_25] : memref<128x128xbf16, #tpu.memory_space<vmem>>, vector<128x128xbf16>
    %c0_26 = arith.constant 0 : index
    %c0_27 = arith.constant 0 : index
    %38 = vector.load %arg12[%c0_26, %c0_27] : memref<1x128xf32, #tpu.memory_space<vmem>>, vector<1x128xf32>
    %39 = arith.truncf %36 : vector<16x128xf32> to vector<16x128xbf16>
    %cst_28 = arith.constant dense<0.000000e+00> : vector<16x128xf32>
    %40 = tpu.matmul %39, %37, %cst_28 {dimension_numbers = #tpu.dot_dimension_numbers<[1], [0], [0], [1], [0, 0, 1, 1], [], []>} : vector<16x128xbf16>, vector<128x128xbf16>, vector<16x128xf32> -> vector<16x128xf32>
    %41 = vector.broadcast %38 : vector<1x128xf32> to vector<16x128xf32>
    %42 = arith.addf %40, %41 : vector<16x128xf32>
    %c0_29 = arith.constant 0 : index
    %c0_30 = arith.constant 0 : index
    %43 = vector.load %arg21[%c0_29, %c0_30] : memref<16x128xf32, #tpu.memory_space<vmem>>, vector<16x128xf32>
    tpu.vector_store %arg21[%c0_29, %c0_30], %42 {strides = array<i32>} : memref<16x128xf32, #tpu.memory_space<vmem>>, vector<16x128xf32>,
    %c0_31 = arith.constant 0 : index
    %c0_32 = arith.constant 0 : index
    %44 = vector.load %arg2[%c0_31, %c0_32] : memref<16x128xf32, #tpu.memory_space<vmem>>, vector<16x128xf32>
    %c0_33 = arith.constant 0 : index
    %c0_34 = arith.constant 0 : index
    %45 = vector.load %arg13[%c0_33, %c0_34] : memref<128x128xbf16, #tpu.memory_space<vmem>>, vector<128x128xbf16>
    %c0_35 = arith.constant 0 : index
    %c0_36 = arith.constant 0 : index
    %46 = vector.load %arg14[%c0_35, %c0_36] : memref<1x128xf32, #tpu.memory_space<vmem>>, vector<1x128xf32>
    %47 = arith.truncf %44 : vector<16x128xf32> to vector<16x128xbf16>
    %cst_37 = arith.constant dense<0.000000e+00> : vector<16x128xf32>
    %48 = tpu.matmul %47, %45, %cst_37 {dimension_numbers = #tpu.dot_dimension_numbers<[1], [0], [0], [1], [0, 0, 1, 1], [], []>} : vector<16x128xbf16>, vector<128x128xbf16>, vector<16x128xf32> -> vector<16x128xf32>
    %49 = vector.broadcast %46 : vector<1x128xf32> to vector<16x128xf32>
    %50 = arith.addf %48, %49 : vector<16x128xf32>
    %cst_38 = arith.constant 2.000000e-01 : f32
    %51 = vector.broadcast %cst_38 : f32 to vector<16x128xf32>
    %52 = arith.mulf %51, %50 : vector<16x128xf32>
    %53 = arith.maximumf %50, %52 : vector<16x128xf32>
    %c0_39 = arith.constant 0 : index
    %c0_40 = arith.constant 0 : index
    %54 = vector.load %arg15[%c0_39, %c0_40] : memref<128x128xbf16, #tpu.memory_space<vmem>>, vector<128x128xbf16>
    %c0_41 = arith.constant 0 : index
    %c0_42 = arith.constant 0 : index
    %55 = vector.load %arg16[%c0_41, %c0_42] : memref<1x128xf32, #tpu.memory_space<vmem>>, vector<1x128xf32>
    %56 = arith.truncf %53 : vector<16x128xf32> to vector<16x128xbf16>
    %cst_43 = arith.constant dense<0.000000e+00> : vector<16x128xf32>
    %57 = tpu.matmul %56, %54, %cst_43 {dimension_numbers = #tpu.dot_dimension_numbers<[1], [0], [0], [1], [0, 0, 1, 1], [], []>} : vector<16x128xbf16>, vector<128x128xbf16>, vector<16x128xf32> -> vector<16x128xf32>
    %58 = vector.broadcast %55 : vector<1x128xf32> to vector<16x128xf32>
    %59 = arith.addf %57, %58 : vector<16x128xf32>
    %cst_44 = arith.constant 2.000000e-01 : f32
    %60 = vector.broadcast %cst_44 : f32 to vector<16x128xf32>
    %61 = arith.mulf %60, %59 : vector<16x128xf32>
    %62 = arith.maximumf %59, %61 : vector<16x128xf32>
    %c0_45 = arith.constant 0 : index
    %c0_46 = arith.constant 0 : index
    %63 = vector.load %arg17[%c0_45, %c0_46] : memref<128x128xbf16, #tpu.memory_space<vmem>>, vector<128x128xbf16>
    %c0_47 = arith.constant 0 : index
    %c0_48 = arith.constant 0 : index
    %64 = vector.load %arg18[%c0_47, %c0_48] : memref<1x128xf32, #tpu.memory_space<vmem>>, vector<1x128xf32>
    %65 = arith.truncf %62 : vector<16x128xf32> to vector<16x128xbf16>
    %cst_49 = arith.constant dense<0.000000e+00> : vector<16x128xf32>
    %66 = tpu.matmul %65, %63, %cst_49 {dimension_numbers = #tpu.dot_dimension_numbers<[1], [0], [0], [1], [0, 0, 1, 1], [], []>} : vector<16x128xbf16>, vector<128x128xbf16>, vector<16x128xf32> -> vector<16x128xf32>
    %67 = vector.broadcast %64 : vector<1x128xf32> to vector<16x128xf32>
    %68 = arith.addf %66, %67 : vector<16x128xf32>
    %cst_50 = arith.constant 2.000000e-01 : f32
    %69 = vector.broadcast %cst_50 : f32 to vector<16x128xf32>
    %70 = arith.mulf %69, %68 : vector<16x128xf32>
    %71 = arith.maximumf %68, %70 : vector<16x128xf32>
    %c0_51 = arith.constant 0 : index
    %c0_52 = arith.constant 0 : index
    %72 = vector.load %arg19[%c0_51, %c0_52] : memref<128x128xbf16, #tpu.memory_space<vmem>>, vector<128x128xbf16>
    %c0_53 = arith.constant 0 : index
    %c0_54 = arith.constant 0 : index
    %73 = vector.load %arg20[%c0_53, %c0_54] : memref<1x128xf32, #tpu.memory_space<vmem>>, vector<1x128xf32>
    %74 = arith.truncf %71 : vector<16x128xf32> to vector<16x128xbf16>
    %cst_55 = arith.constant dense<0.000000e+00> : vector<16x128xf32>
    %75 = tpu.matmul %74, %72, %cst_55 {dimension_numbers = #tpu.dot_dimension_numbers<[1], [0], [0], [1], [0, 0, 1, 1], [], []>} : vector<16x128xbf16>, vector<128x128xbf16>, vector<16x128xf32> -> vector<16x128xf32>
    %76 = vector.broadcast %73 : vector<1x128xf32> to vector<16x128xf32>
    %77 = arith.addf %75, %76 : vector<16x128xf32>
    %78 = vector.extract_strided_slice %77 {offsets = [0, 0], sizes = [16, 1], strides = [1, 1]} : vector<16x128xf32> to vector<16x1xf32>
    %cst_56 = arith.constant 0.000000e+00 : f32
    %79 = vector.broadcast %cst_56 : f32 to vector<16x1xf32>
    %80 = arith.subf %79, %78 : vector<16x1xf32>
    %81 = math.exp %80 : vector<16x1xf32>
    %cst_57 = arith.constant 1.000000e+00 : f32
    %82 = vector.broadcast %cst_57 : f32 to vector<16x1xf32>
    %83 = arith.addf %82, %81 : vector<16x1xf32>
    %84 = tpu.reciprocal %83 {approx = true} : vector<16x1xf32> -> vector<16x1xf32>
    %85 = vector.broadcast %84 : vector<16x1xf32> to vector<16x128xf32>
    %86 = arith.mulf %77, %85 : vector<16x128xf32>
    %c0_58 = arith.constant 0 : index
    %c0_59 = arith.constant 0 : index
    %87 = vector.load %arg22[%c0_58, %c0_59] : memref<16x128xf32, #tpu.memory_space<vmem>>, vector<16x128xf32>
    tpu.vector_store %arg22[%c0_58, %c0_59], %86 {strides = array<i32>} : memref<16x128xf32, #tpu.memory_space<vmem>>, vector<16x128xf32>,
    return
  }
  func.func @transform_0(%arg0: i32) -> (i32, i32) {
    %c0_i32 = arith.constant 0 : i32
    %c0_i32_0 = arith.constant 0 : i32
    return %arg0, %c0_i32 : i32, i32
  }
  func.func @transform_1(%arg0: i32) -> (i32, i32) {
    %c0_i32 = arith.constant 0 : i32
    %c0_i32_0 = arith.constant 0 : i32
    return %arg0, %c0_i32 : i32, i32
  }
  func.func @transform_2(%arg0: i32) -> (i32, i32) {
    %c0_i32 = arith.constant 0 : i32
    %c0_i32_0 = arith.constant 0 : i32
    %c0_i32_1 = arith.constant 0 : i32
    return %c0_i32, %c0_i32_0 : i32, i32
  }
  func.func @transform_3(%arg0: i32) -> (i32, i32) {
    %c0_i32 = arith.constant 0 : i32
    %c0_i32_0 = arith.constant 0 : i32
    %c0_i32_1 = arith.constant 0 : i32
    return %c0_i32, %c0_i32_0 : i32, i32
  }
  func.func @transform_4(%arg0: i32) -> (i32, i32) {
    %c0_i32 = arith.constant 0 : i32
    %c0_i32_0 = arith.constant 0 : i32
    %c0_i32_1 = arith.constant 0 : i32
    return %c0_i32, %c0_i32_0 : i32, i32
  }
  func.func @transform_5(%arg0: i32) -> (i32, i32) {
    %c0_i32 = arith.constant 0 : i32
    %c0_i32_0 = arith.constant 0 : i32
    %c0_i32_1 = arith.constant 0 : i32
    return %c0_i32, %c0_i32_0 : i32, i32
  }
  func.func @transform_6(%arg0: i32) -> (i32, i32) {
    %c0_i32 = arith.constant 0 : i32
    %c0_i32_0 = arith.constant 0 : i32
    %c0_i32_1 = arith.constant 0 : i32
    return %c0_i32, %c0_i32_0 : i32, i32
  }
  func.func @transform_7(%arg0: i32) -> (i32, i32) {
    %c0_i32 = arith.constant 0 : i32
    %c0_i32_0 = arith.constant 0 : i32
    %c0_i32_1 = arith.constant 0 : i32
    return %c0_i32, %c0_i32_0 : i32, i32
  }
  func.func @transform_8(%arg0: i32) -> (i32, i32) {
    %c0_i32 = arith.constant 0 : i32
    %c0_i32_0 = arith.constant 0 : i32
    %c0_i32_1 = arith.constant 0 : i32
    return %c0_i32, %c0_i32_0 : i32, i32
  }
  func.func @transform_9(%arg0: i32) -> (i32, i32) {
    %c0_i32 = arith.constant 0 : i32
    %c0_i32_0 = arith.constant 0 : i32
    %c0_i32_1 = arith.constant 0 : i32
    return %c0_i32, %c0_i32_0 : i32, i32
  }
  func.func @transform_10(%arg0: i32) -> (i32, i32) {
    %c0_i32 = arith.constant 0 : i32
    %c0_i32_0 = arith.constant 0 : i32
    %c0_i32_1 = arith.constant 0 : i32
    return %c0_i32, %c0_i32_0 : i32, i32
  }
  func.func @transform_11(%arg0: i32) -> (i32, i32) {
    %c0_i32 = arith.constant 0 : i32
    %c0_i32_0 = arith.constant 0 : i32
    %c0_i32_1 = arith.constant 0 : i32
    return %c0_i32, %c0_i32_0 : i32, i32
  }
  func.func @transform_12(%arg0: i32) -> (i32, i32) {
    %c0_i32 = arith.constant 0 : i32
    %c0_i32_0 = arith.constant 0 : i32
    %c0_i32_1 = arith.constant 0 : i32
    return %c0_i32, %c0_i32_0 : i32, i32
  }
  func.func @transform_13(%arg0: i32) -> (i32, i32) {
    %c0_i32 = arith.constant 0 : i32
    %c0_i32_0 = arith.constant 0 : i32
    %c0_i32_1 = arith.constant 0 : i32
    return %c0_i32, %c0_i32_0 : i32, i32
  }
  func.func @transform_14(%arg0: i32) -> (i32, i32) {
    %c0_i32 = arith.constant 0 : i32
    %c0_i32_0 = arith.constant 0 : i32
    %c0_i32_1 = arith.constant 0 : i32
    return %c0_i32, %c0_i32_0 : i32, i32
  }
  func.func @transform_15(%arg0: i32) -> (i32, i32) {
    %c0_i32 = arith.constant 0 : i32
    %c0_i32_0 = arith.constant 0 : i32
    %c0_i32_1 = arith.constant 0 : i32
    return %c0_i32, %c0_i32_0 : i32, i32
  }
  func.func @transform_16(%arg0: i32) -> (i32, i32) {
    %c0_i32 = arith.constant 0 : i32
    %c0_i32_0 = arith.constant 0 : i32
    %c0_i32_1 = arith.constant 0 : i32
    return %c0_i32, %c0_i32_0 : i32, i32
  }
  func.func @transform_17(%arg0: i32) -> (i32, i32) {
    %c0_i32 = arith.constant 0 : i32
    %c0_i32_0 = arith.constant 0 : i32
    %c0_i32_1 = arith.constant 0 : i32
    return %c0_i32, %c0_i32_0 : i32, i32
  }
  func.func @transform_18(%arg0: i32) -> (i32, i32) {
    %c0_i32 = arith.constant 0 : i32
    %c0_i32_0 = arith.constant 0 : i32
    %c0_i32_1 = arith.constant 0 : i32
    return %c0_i32, %c0_i32_0 : i32, i32
  }
  func.func @transform_19(%arg0: i32) -> (i32, i32) {
    %c0_i32 = arith.constant 0 : i32
    %c0_i32_0 = arith.constant 0 : i32
    %c0_i32_1 = arith.constant 0 : i32
    return %c0_i32, %c0_i32_0 : i32, i32
  }
  func.func @transform_20(%arg0: i32) -> (i32, i32) {
    %c0_i32 = arith.constant 0 : i32
    %c0_i32_0 = arith.constant 0 : i32
    return %arg0, %c0_i32 : i32, i32
  }
  func.func @transform_21(%arg0: i32) -> (i32, i32) {
    %c0_i32 = arith.constant 0 : i32
    %c0_i32_0 = arith.constant 0 : i32
    return %arg0, %c0_i32 : i32, i32
  }
}

</mosaic_0001>

<bundles_post_ra>
// kernel: tpu_custom_call.1
= control target key start
LH: loop header
LB: loop body
LE: loop exit
PB: predicated region body
PF: predicated region fallthrough
CT: control target
= control target key end

     0   :  { %s2675_s0 = inlined_call_operand.hbm [shape: f32[16,128], index: 0, kind: input, shape index: {}]   ;;  %s2676_s1 = inlined_call_operand.hbm [shape: f32[16,128], index: 1, kind: input, shape index: {}]   ;;  %s2677_s2 = inlined_call_operand.hbm [shape: bf16[128,128], index: 2, kind: input, shape index: {}]   ;;  %s2678_s3 = inlined_call_operand.vmem [shape: f32[1,128], index: 3, kind: input, shape index: {}]   ;;  %s2679_s4 = inlined_call_operand.hbm [shape: bf16[128,128], index: 4, kind: input, shape index: {}]   ;;  %s2680_s5 = inlined_call_operand.vmem [shape: f32[1,128], index: 5, kind: input, shape index: {}]   ;;  %s2681_s6 = inlined_call_operand.hbm [shape: bf16[128,128], index: 6, kind: input, shape index: {}]   ;;  %s2682_s7 = inlined_call_operand.vmem [shape: f32[1,128], index: 7, kind: input, shape index: {}]   ;;  %s2683_s8 = inlined_call_operand.hbm [shape: bf16[128,128], index: 8, kind: input, shape index: {}]   ;;  %s2684_s9 = inlined_call_operand.vmem [shape: f32[1,128], index: 9, kind: input, shape index: {}]   ;;  %s2685_s10 = inlined_call_operand.hbm [shape: bf16[128,128], index: 10, kind: input, shape index: {}]   ;;  %s2686_s11 = inlined_call_operand.hbm [shape: f32[1,128], index: 11, kind: input, shape index: {}]   ;;  %s2687_s12 = inlined_call_operand.hbm [shape: bf16[128,128], index: 12, kind: input, shape index: {}]   ;;  %s2688_s13 = inlined_call_operand.hbm [shape: f32[1,128], index: 13, kind: input, shape index: {}]   ;;  %s2689_s14 = inlined_call_operand.hbm [shape: bf16[128,128], index: 14, kind: input, shape index: {}]   ;;  %s2690_s15 = inlined_call_operand.hbm [shape: f32[1,128], index: 15, kind: input, shape index: {}]   ;;  %s2691_s16 = inlined_call_operand.hbm [shape: bf16[128,128], index: 16, kind: input, shape index: {}]   ;;  %s2692_s17 = inlined_call_operand.hbm [shape: f32[1,128], index: 17, kind: input, shape index: {}]   ;;  %s2693_s18 = inlined_call_operand.vmem [shape: bf16[128,128], index: 18, kind: input, shape index: {}]   ;;  %s2694_s19 = inlined_call_operand.vmem [shape: f32[1,128], index: 19, kind: input, shape index: {}]   ;;  %s2695_s20 = inlined_call_operand.hbm [shape: f32[16,128], index: 20, kind: output, shape index: {0}]   ;;  %s2696_s21 = inlined_call_operand.hbm [shape: f32[16,128], index: 21, kind: output, shape index: {1}]  }
   0x1   :  { %2703 = sst [smem:[#allocation38_spill]] %s2675_s0 }
   0x2   :  { %2704 = sst [smem:[#allocation39_spill]] %s2676_s1 }
   0x3   :  { %2705 = sst [smem:[#allocation40_spill]] %s2677_s2 }
   0x4   :  { %2706 = sst [smem:[#allocation41_spill]] %s2678_s3 }
   0x5   :  { %2707 = sst [smem:[#allocation42_spill]] %s2679_s4 }
   0x6   :  { %2708 = sst [smem:[#allocation43_spill]] %s2680_s5 }
   0x7   :  { %2709 = sst [smem:[#allocation44_spill]] %s2694_s19 }
   0x8   :  { %2710 = sst [smem:[#allocation45_spill]] %s2695_s20 }
   0x9   :  { %2711 = sst [smem:[#allocation46_spill]] %s2696_s21 }
   0xa   :  { %27 = vsyncpa [#allocation3], 0 }
   0xb   :  { %28 = vsyncpa [#allocation6], 0 }
   0xc   :  { %29 = vsyncpa [#allocation9], 0 }
   0xd   :  { %30 = vsyncpa [#allocation12], 0 }
   0xe   :  { %31 = vsyncpa [#allocation15], 0 }
   0xf   :  { %32 = vsyncpa [#allocation18], 0 }
  0x10   :  { %33 = vsyncpa [#allocation21], 0 }
  0x11   :  { %34 = vsyncpa [#allocation24], 0 }
  0x12   :  { %35 = vsyncpa [#allocation4], 0 }
  0x13   :  { %36 = vsyncpa [#allocation27], 0  ;;  %s2185_s2 = smov [#allocation5]   ;;  %s2712_s3 = sld [smem:[#allocation39_spill]] }
  0x14   :  { %s54_s25 = sshll.u32 %s2185_s2, 4  ;;  %s55_s25 = int_to_ptr.vmem [resolvable:$true] %s54_s25 }
  0x19   :  { %s1813_s28 = scalar_lea.hbm %s2712_s3, 256 }
  0x1a   :  { %p1814_p0 = scmp.ne.s32.totalorder %s2712_s3, %s1813_s28  ;;  %p1817_p1 = scmp.lt.u32.totalorder %s1813_s28, %s2712_s3 }
  0x1c   :  { %p1819_p2 = pnand %p1817_p1, %p1814_p0 }
  0x1e   :  { %1822 = shalt.err (!%p1819_p2)
}
  0x1f   :  { %s1823_s5 = scalar_lea.vmem %s55_s25, 256  ;;  %p1828_p4 = scmp.lt.s32.totalorder %s55_s25, %s55_s25 }
  0x20   :  { %p1824_p3 = scmp.ne.s32.totalorder %s55_s25, %s1823_s5  ;;  %p1829_p5 = scmp.lt.s32.totalorder %s1823_s5, %s1823_s5 }
  0x22   :  { %p1830_p6 = por %p1829_p5, %p1828_p4 }
  0x24   :  { %p1831_p7 = pnand %p1830_p6, %p1824_p3 }
  0x26   :  { %1834 = shalt.err (!%p1831_p7)
}
  0x27   :  { %s2186_s22 = smov 128   ;;  %s2187_s23 = smov 8  }
  0x28   :  { %60 = dma.hbm_to_vmem [thread:$0]  %s2712_s3, 256, %s55_s25, [#allocation6], %s2186_s22, %s2186_s22, %s2187_s23  }
  0x29   :  { %s2188_s2 = smov [#allocation8]   ;;  %s2189_s27 = smov [#allocation11]  }
  0x2a   :  { %s80_s26 = sshll.u32 %s2188_s2, 4  ;;  %s108_s28 = sshll.u32 %s2189_s27, 4  ;;  %s81_s26 = int_to_ptr.vmem [resolvable:$true] %s80_s26  ;;  %s109_s28 = int_to_ptr.vmem [resolvable:$true] %s108_s28 }
  0x2b   :  { %s2713_s4 = sld [smem:[#allocation42_spill]] }
  0x31   :  { %s1835_s30 = scalar_lea.hbm %s2713_s4, 1024 }
  0x32   :  { %p1836_p8 = scmp.ne.s32.totalorder %s2713_s4, %s1835_s30  ;;  %p1839_p9 = scmp.lt.u32.totalorder %s1835_s30, %s2713_s4 }
  0x34   :  { %p1841_p10 = pnand %p1839_p9, %p1836_p8 }
  0x36   :  { %1844 = shalt.err (!%p1841_p10)
}
  0x37   :  { %s1845_s25 = scalar_lea.vmem %s81_s26, 1024  ;;  %p1850_p12 = scmp.lt.s32.totalorder %s81_s26, %s81_s26 }
  0x38   :  { %p1846_p11 = scmp.ne.s32.totalorder %s81_s26, %s1845_s25  ;;  %p1851_p13 = scmp.lt.s32.totalorder %s1845_s25, %s1845_s25 }
  0x3a   :  { %p1852_p0 = por %p1851_p13, %p1850_p12 }
  0x3c   :  { %p1853_p1 = pnand %p1852_p0, %p1846_p11 }
  0x3e   :  { %1856 = shalt.err (!%p1853_p1)
}
  0x3f   :  { %s2190_s3 = smov 64   ;;  %s2191_s1 = smov 4  }
  0x40   :  { %86 = dma.hbm_to_vmem [thread:$0]  %s2713_s4, 1024, %s81_s26, [#allocation9], %s2190_s3, %s2190_s3, %s2191_s1  }
  0x41   :  { %s1857_s2 = scalar_lea.hbm %s2683_s8, 1024 }
  0x42   :  { %p1858_p2 = scmp.ne.s32.totalorder %s2683_s8, %s1857_s2  ;;  %p1861_p3 = scmp.lt.u32.totalorder %s1857_s2, %s2683_s8 }
  0x44   :  { %p1863_p4 = pnand %p1861_p3, %p1858_p2 }
  0x46   :  { %1866 = shalt.err (!%p1863_p4)
}
  0x47   :  { %s1867_s5 = scalar_lea.vmem %s109_s28, 1024  ;;  %p1872_p6 = scmp.lt.s32.totalorder %s109_s28, %s109_s28 }
  0x48   :  { %p1868_p5 = scmp.ne.s32.totalorder %s109_s28, %s1867_s5  ;;  %p1873_p7 = scmp.lt.s32.totalorder %s1867_s5, %s1867_s5 }
  0x4a   :  { %p1874_p8 = por %p1873_p7, %p1872_p6 }
  0x4c   :  { %p1875_p9 = pnand %p1874_p8, %p1868_p5 }
  0x4e   :  { %1878 = shalt.err (!%p1875_p9)
}
  0x4f   :  { %114 = dma.hbm_to_vmem [thread:$0]  %s2683_s8, 1024, %s109_s28, [#allocation12], %s2190_s3, %s2190_s3, %s2191_s1  }
  0x50   :  { %s2192_s25 = smov [#allocation14]   ;;  %s2193_s24 = smov [#allocation17]  }
  0x51   :  { %s135_s21 = sshll.u32 %s2192_s25, 4  ;;  %s157_s19 = sshll.u32 %s2193_s24, 4  ;;  %s136_s21 = int_to_ptr.vmem [resolvable:$true] %s135_s21  ;;  %s158_s19 = int_to_ptr.vmem [resolvable:$true] %s157_s19 }
  0x52   :  { %s1879_s27 = scalar_lea.hbm %s2686_s11, 16 }
  0x53   :  { %p1880_p10 = scmp.ne.s32.totalorder %s2686_s11, %s1879_s27  ;;  %p1883_p11 = scmp.lt.u32.totalorder %s1879_s27, %s2686_s11 }
  0x55   :  { %p1885_p12 = pnand %p1883_p11, %p1880_p10 }
  0x57   :  { %1888 = shalt.err (!%p1885_p12)
}
  0x58   :  { %s1889_s8 = scalar_lea.vmem %s136_s21, 16  ;;  %s1893_s28 = scalar_lea.vmem %s136_s21, 32 }
  0x59   :  { %p1890_p13 = scmp.ne.s32.totalorder %s136_s21, %s1889_s8  ;;  %p1894_p0 = scmp.lt.s32.totalorder %s136_s21, %s136_s21 }
  0x5a   :  { %p1895_p1 = scmp.lt.s32.totalorder %s1893_s28, %s1889_s8 }
  0x5c   :  { %p1896_p2 = por %p1895_p1, %p1894_p0 }
  0x5e   :  { %p1897_p3 = pnand %p1896_p2, %p1890_p13 }
  0x60   :  { %1900 = shalt.err (!%p1897_p3)
}
  0x61   :  { %138 = dma.hbm_to_vmem [thread:$0]  %s2686_s11, 16, %s136_s21, [#allocation15]  }
  0x62   :  { %s1901_s20 = scalar_lea.hbm %s2688_s13, 16 }
  0x63   :  { %p1902_p4 = scmp.ne.s32.totalorder %s2688_s13, %s1901_s20  ;;  %p1905_p5 = scmp.lt.u32.totalorder %s1901_s20, %s2688_s13 }
  0x65   :  { %p1907_p6 = pnand %p1905_p5, %p1902_p4 }
  0x67   :  { %1910 = shalt.err (!%p1907_p6)
}
  0x68   :  { %s1911_s30 = scalar_lea.vmem %s158_s19, 16  ;;  %s1915_s5 = scalar_lea.vmem %s158_s19, 32 }
  0x69   :  { %p1912_p7 = scmp.ne.s32.totalorder %s158_s19, %s1911_s30  ;;  %p1916_p8 = scmp.lt.s32.totalorder %s158_s19, %s158_s19 }
  0x6a   :  { %p1917_p9 = scmp.lt.s32.totalorder %s1915_s5, %s1911_s30 }
  0x6c   :  { %p1918_p10 = por %p1917_p9, %p1916_p8 }
  0x6e   :  { %p1919_p11 = pnand %p1918_p10, %p1912_p7 }
  0x70   :  { %1922 = shalt.err (!%p1919_p11)
}
  0x71   :  { %160 = dma.hbm_to_vmem [thread:$0]  %s2688_s13, 16, %s158_s19, [#allocation18]  }
  0x72   :  { %s2194_s8 = smov [#allocation20]   ;;  %s2195_s26 = smov [#allocation2]  }
  0x73   :  { %s179_s28 = sshll.u32 %s2194_s8, 4  ;;  %s42_s4 = sshll.u32 %s2195_s26, 4  ;;  %s180_s28 = int_to_ptr.vmem [resolvable:$true] %s179_s28  ;;  %s43_s4 = int_to_ptr.vmem [resolvable:$true] %s42_s4 }
  0x74   :  { %s1923_s20 = scalar_lea.hbm %s2690_s15, 16 }
  0x75   :  { %p1924_p12 = scmp.ne.s32.totalorder %s2690_s15, %s1923_s20  ;;  %p1927_p13 = scmp.lt.u32.totalorder %s1923_s20, %s2690_s15 }
  0x77   :  { %p1929_p0 = pnand %p1927_p13, %p1924_p12 }
  0x79   :  { %1932 = shalt.err (!%p1929_p0)
}
  0x7a   :  { %s1933_s13 = scalar_lea.vmem %s180_s28, 16  ;;  %s1937_s19 = scalar_lea.vmem %s180_s28, 32 }
  0x7b   :  { %p1934_p1 = scmp.ne.s32.totalorder %s180_s28, %s1933_s13  ;;  %p1938_p2 = scmp.lt.s32.totalorder %s180_s28, %s180_s28 }
  0x7c   :  { %p1939_p3 = scmp.lt.s32.totalorder %s1937_s19, %s1933_s13 }
  0x7e   :  { %p1940_p4 = por %p1939_p3, %p1938_p2 }
  0x80   :  { %p1941_p5 = pnand %p1940_p4, %p1934_p1 }
  0x82   :  { %1944 = shalt.err (!%p1941_p5)
}
  0x83   :  { %182 = dma.hbm_to_vmem [thread:$0]  %s2690_s15, 16, %s180_s28, [#allocation21]  }
  0x84   :  { %s2714_s8 = sld [smem:[#allocation38_spill]] }
  0x8a   :  { %s1945_s26 = scalar_lea.hbm %s2714_s8, 256 }
  0x8b   :  { %p1946_p6 = scmp.ne.s32.totalorder %s2714_s8, %s1945_s26  ;;  %p1949_p7 = scmp.lt.u32.totalorder %s1945_s26, %s2714_s8 }
  0x8d   :  { %p1951_p8 = pnand %p1949_p7, %p1946_p6 }
  0x8f   :  { %1954 = shalt.err (!%p1951_p8)
}
  0x90   :  { %s1955_s27 = scalar_lea.vmem %s43_s4, 256  ;;  %p1960_p10 = scmp.lt.s32.totalorder %s43_s4, %s43_s4 }
  0x91   :  { %p1956_p9 = scmp.ne.s32.totalorder %s43_s4, %s1955_s27  ;;  %p1961_p11 = scmp.lt.s32.totalorder %s1955_s27, %s1955_s27 }
  0x93   :  { %p1962_p12 = por %p1961_p11, %p1960_p10 }
  0x95   :  { %p1963_p13 = pnand %p1962_p12, %p1956_p9 }
  0x97   :  { %1966 = shalt.err (!%p1963_p13)
}
  0x98   :  { %48 = dma.hbm_to_vmem [thread:$0]  %s2714_s8, 256, %s43_s4, [#allocation3], %s2186_s22, %s2186_s22, %s2187_s23  }
  0x99   :  { %s2196_s29 = smov [#allocation7]   ;;  %s2197_s13 = smov [#allocation10]  }
  0x9a   :  { %s66_s0 = sshll.u32 %s2196_s29, 4  ;;  %s94_s19 = sshll.u32 %s2197_s13, 4  ;;  %s67_s0 = int_to_ptr.vmem [resolvable:$true] %s66_s0  ;;  %s95_s19 = int_to_ptr.vmem [resolvable:$true] %s94_s19 }
  0x9b   :  { %s2715_s11 = sld [smem:[#allocation40_spill]] }
  0xa1   :  { %s1967_s21 = scalar_lea.hbm %s2715_s11, 1024 }
  0xa2   :  { %p1968_p0 = scmp.ne.s32.totalorder %s2715_s11, %s1967_s21  ;;  %p1971_p1 = scmp.lt.u32.totalorder %s1967_s21, %s2715_s11 }
  0xa4   :  { %p1973_p2 = pnand %p1971_p1, %p1968_p0 }
  0xa6   :  { %1976 = shalt.err (!%p1973_p2)
}
  0xa7   :  { %s1977_s4 = scalar_lea.vmem %s67_s0, 1024  ;;  %p1982_p4 = scmp.lt.s32.totalorder %s67_s0, %s67_s0 }
  0xa8   :  { %p1978_p3 = scmp.ne.s32.totalorder %s67_s0, %s1977_s4  ;;  %p1983_p5 = scmp.lt.s32.totalorder %s1977_s4, %s1977_s4 }
  0xaa   :  { %p1984_p6 = por %p1983_p5, %p1982_p4 }
  0xac   :  { %p1985_p7 = pnand %p1984_p6, %p1978_p3 }
  0xae   :  { %1988 = shalt.err (!%p1985_p7)
}
  0xaf   :  { %72 = dma.hbm_to_vmem [thread:$0]  %s2715_s11, 1024, %s67_s0, [#allocation6], %s2190_s3, %s2190_s3, %s2191_s1  }
  0xb0   :  { %s1989_s28 = scalar_lea.hbm %s2681_s6, 1024 }
  0xb1   :  { %p1990_p8 = scmp.ne.s32.totalorder %s2681_s6, %s1989_s28  ;;  %p1993_p9 = scmp.lt.u32.totalorder %s1989_s28, %s2681_s6 }
  0xb3   :  { %p1995_p10 = pnand %p1993_p9, %p1990_p8 }
  0xb5   :  { %1998 = shalt.err (!%p1995_p10)
}
  0xb6   :  { %s1999_s21 = scalar_lea.vmem %s95_s19, 1024  ;;  %p2004_p12 = scmp.lt.s32.totalorder %s95_s19, %s95_s19 }
  0xb7   :  { %p2000_p11 = scmp.ne.s32.totalorder %s95_s19, %s1999_s21  ;;  %p2005_p13 = scmp.lt.s32.totalorder %s1999_s21, %s1999_s21 }
  0xb9   :  { %p2006_p0 = por %p2005_p13, %p2004_p12 }
  0xbb   :  { %p2007_p1 = pnand %p2006_p0, %p2000_p11 }
  0xbd   :  { %2010 = shalt.err (!%p2007_p1)
}
  0xbe   :  { %100 = dma.hbm_to_vmem [thread:$0]  %s2681_s6, 1024, %s95_s19, [#allocation9], %s2190_s3, %s2190_s3, %s2191_s1  }
  0xbf   :  { %s2198_s26 = smov [#allocation13]   ;;  %s2199_s24 = smov [#allocation16]  }
  0xc0   :  { %s122_s25 = sshll.u32 %s2198_s26, 4  ;;  %s144_s20 = sshll.u32 %s2199_s24, 4  ;;  %s123_s25 = int_to_ptr.vmem [resolvable:$true] %s122_s25  ;;  %s145_s20 = int_to_ptr.vmem [resolvable:$true] %s144_s20 }
  0xc1   :  { %s2011_s2 = scalar_lea.hbm %s2685_s10, 1024 }
  0xc2   :  { %p2012_p2 = scmp.ne.s32.totalorder %s2685_s10, %s2011_s2  ;;  %p2015_p3 = scmp.lt.u32.totalorder %s2011_s2, %s2685_s10 }
  0xc4   :  { %p2017_p4 = pnand %p2015_p3, %p2012_p2 }
  0xc6   :  { %2020 = shalt.err (!%p2017_p4)
}
  0xc7   :  { %s2021_s6 = scalar_lea.vmem %s123_s25, 1024  ;;  %p2026_p6 = scmp.lt.s32.totalorder %s123_s25, %s123_s25 }
  0xc8   :  { %p2022_p5 = scmp.ne.s32.totalorder %s123_s25, %s2021_s6  ;;  %p2027_p7 = scmp.lt.s32.totalorder %s2021_s6, %s2021_s6 }
  0xca   :  { %p2028_p8 = por %p2027_p7, %p2026_p6 }
  0xcc   :  { %p2029_p9 = pnand %p2028_p8, %p2022_p5 }
  0xce   :  { %2032 = shalt.err (!%p2029_p9)
}
  0xcf   :  { %128 = dma.hbm_to_vmem [thread:$0]  %s2685_s10, 1024, %s123_s25, [#allocation12], %s2190_s3, %s2190_s3, %s2191_s1  }
  0xd0   :  { %s2033_s21 = scalar_lea.hbm %s2687_s12, 1024 }
  0xd1   :  { %p2034_p10 = scmp.ne.s32.totalorder %s2687_s12, %s2033_s21  ;;  %p2037_p11 = scmp.lt.u32.totalorder %s2033_s21, %s2687_s12 }
  0xd3   :  { %p2039_p12 = pnand %p2037_p11, %p2034_p10 }
  0xd5   :  { %2042 = shalt.err (!%p2039_p12)
}
  0xd6   :  { %s2043_s4 = scalar_lea.vmem %s145_s20, 1024  ;;  %p2048_p0 = scmp.lt.s32.totalorder %s145_s20, %s145_s20 }
  0xd7   :  { %p2044_p13 = scmp.ne.s32.totalorder %s145_s20, %s2043_s4  ;;  %p2049_p1 = scmp.lt.s32.totalorder %s2043_s4, %s2043_s4 }
  0xd9   :  { %p2050_p2 = por %p2049_p1, %p2048_p0 }
  0xdb   :  { %p2051_p3 = pnand %p2050_p2, %p2044_p13 }
  0xdd   :  { %2054 = shalt.err (!%p2051_p3)
}
  0xde   :  { %150 = dma.hbm_to_vmem [thread:$0]  %s2687_s12, 1024, %s145_s20, [#allocation15], %s2190_s3, %s2190_s3, %s2191_s1  }
  0xdf   :  { %s2200_s8 = smov [#allocation19]   ;;  %s2201_s27 = smov [#allocation22]  }
  0xe0   :  { %s166_s2 = sshll.u32 %s2200_s8, 4  ;;  %s188_s15 = sshll.u32 %s2201_s27, 4  ;;  %s167_s2 = int_to_ptr.vmem [resolvable:$true] %s166_s2  ;;  %s189_s15 = int_to_ptr.vmem [resolvable:$true] %s188_s15 }
  0xe1   :  { %s2055_s6 = scalar_lea.hbm %s2689_s14, 1024 }
  0xe2   :  { %p2056_p4 = scmp.ne.s32.totalorder %s2689_s14, %s2055_s6  ;;  %p2059_p5 = scmp.lt.u32.totalorder %s2055_s6, %s2689_s14 }
  0xe4   :  { %p2061_p6 = pnand %p2059_p5, %p2056_p4 }
  0xe6   :  { %2064 = shalt.err (!%p2061_p6)
}
  0xe7   :  { %s2065_s12 = scalar_lea.vmem %s167_s2, 1024  ;;  %p2070_p8 = scmp.lt.s32.totalorder %s167_s2, %s167_s2 }
  0xe8   :  { %p2066_p7 = scmp.ne.s32.totalorder %s167_s2, %s2065_s12  ;;  %p2071_p9 = scmp.lt.s32.totalorder %s2065_s12, %s2065_s12 }
  0xea   :  { %p2072_p10 = por %p2071_p9, %p2070_p8 }
  0xec   :  { %p2073_p11 = pnand %p2072_p10, %p2066_p7 }
  0xee   :  { %2076 = shalt.err (!%p2073_p11)
}
  0xef   :  { %172 = dma.hbm_to_vmem [thread:$0]  %s2689_s14, 1024, %s167_s2, [#allocation18], %s2190_s3, %s2190_s3, %s2191_s1  }
  0xf0   :  { %s2077_s26 = scalar_lea.hbm %s2691_s16, 1024 }
  0xf1   :  { %p2078_p12 = scmp.ne.s32.totalorder %s2691_s16, %s2077_s26  ;;  %p2081_p13 = scmp.lt.u32.totalorder %s2077_s26, %s2691_s16 }
  0xf3   :  { %p2083_p0 = pnand %p2081_p13, %p2078_p12 }
  0xf5   :  { %2086 = shalt.err (!%p2083_p0)
}
  0xf6   :  { %s2087_s8 = scalar_lea.vmem %s189_s15, 1024  ;;  %p2092_p2 = scmp.lt.s32.totalorder %s189_s15, %s189_s15 }
  0xf7   :  { %p2088_p1 = scmp.ne.s32.totalorder %s189_s15, %s2087_s8  ;;  %p2093_p3 = scmp.lt.s32.totalorder %s2087_s8, %s2087_s8 }
  0xf9   :  { %p2094_p4 = por %p2093_p3, %p2092_p2 }
  0xfb   :  { %p2095_p5 = pnand %p2094_p4, %p2088_p1 }
  0xfd   :  { %2098 = shalt.err (!%p2095_p5)
}
  0xfe   :  { %194 = dma.hbm_to_vmem [thread:$0]  %s2691_s16, 1024, %s189_s15, [#allocation21], %s2190_s3, %s2190_s3, %s2191_s1  }
  0xff   :  { %s2202_s27 = smov [#allocation23]   ;;  %s2099_s19 = scalar_lea.hbm %s2692_s17, 16 }
 0x100   :  { %s201_s28 = sshll.u32 %s2202_s27, 4  ;;  %p2100_p6 = scmp.ne.s32.totalorder %s2692_s17, %s2099_s19  ;;  %s202_s28 = int_to_ptr.vmem [resolvable:$true] %s201_s28 }
 0x101   :  { %p2103_p7 = scmp.lt.u32.totalorder %s2099_s19, %s2692_s17 }
 0x103   :  { %p2105_p8 = pnand %p2103_p7, %p2100_p6 }
 0x105   :  { %2108 = shalt.err (!%p2105_p8)
}
 0x106   :  { %s2109_s20 = scalar_lea.vmem %s202_s28, 16  ;;  %s2113_s16 = scalar_lea.vmem %s202_s28, 32 }
 0x107   :  { %p2110_p9 = scmp.ne.s32.totalorder %s202_s28, %s2109_s20  ;;  %p2114_p10 = scmp.lt.s32.totalorder %s202_s28, %s202_s28 }
 0x108   :  { %p2115_p11 = scmp.lt.s32.totalorder %s2113_s16, %s2109_s20 }
 0x10a   :  { %p2116_p12 = por %p2115_p11, %p2114_p10 }
 0x10c   :  { %p2117_p13 = pnand %p2116_p12, %p2110_p9 }
 0x10e   :  { %2120 = shalt.err (!%p2117_p13)
}
 0x10f   :  { %204 = dma.hbm_to_vmem [thread:$0]  %s2692_s17, 16, %s202_s28, [#allocation24]  }
 0x110   :  { %2165 = dma.done.wait [#allocation3], 256  }
 0x111   :  { %2166 = vsyncadd [#allocation3], 4294967040 }
 0x112   :  { %2167 = dma.done.wait [#allocation6], 1280  }
 0x113   :  { %2168 = vsyncadd [#allocation6], 4294966016 }
 0x114   :  { %2169 = dma.done.wait [#allocation9], 2048  }
 0x115   :  { %2170 = vsyncadd [#allocation9], 4294965248 }
 0x116   :  { %2171 = dma.done.wait [#allocation12], 2048  }
 0x117   :  { %2172 = vsyncadd [#allocation12], 4294965248 }
 0x118   :  { %2173 = dma.done.wait [#allocation15], 1040  }
 0x119   :  { %2174 = vsyncadd [#allocation15], 4294966256 }
 0x11a   :  { %2175 = dma.done.wait [#allocation18], 1040  }
 0x11b   :  { %2176 = vsyncadd [#allocation18], 4294966256 }
 0x11c   :  { %2177 = dma.done.wait [#allocation21], 1040  }
 0x11d   :  { %2178 = vsyncadd [#allocation21], 4294966256 }
 0x11e   :  { %2179 = dma.done.wait [#allocation24], 16  }
 0x11f   :  { %2180 = vsyncadd [#allocation24], 4294967280  ;;  %v2203_v0 = vmov 0.0   ;;  %vm2204_vm0 = vmmov 0   ;;  %v1733_v1 = vld [vmem:[#allocation7] sm:$0xff]   ;;  %v1734_v2 = vld [vmem:[#allocation7 + $0x8] sm:$0xff]  }
 0x120   :  { %1529 = vmatprep.subr.bf16.mxu0 %v2203_v0  ;;  %1545 = vmatprep.mubr.msk.bf16.mxu0 %vm2204_vm0, %v2203_v0  ;;  %v1735_v3 = vld [vmem:[#allocation7 + $0x10] sm:$0xff]   ;;  %v1741_v4 = vld [vmem:[#allocation8] sm:$0xff]   ;;  %v1736_v5 = vld [vmem:[#allocation7 + $0x18] sm:$0xff]   ;;  %s2716_s21 = sld [smem:[#allocation41_spill]]  ;;  %s2717_s26 = sld [smem:[#allocation43_spill]] }
 0x121   :  { %1549 = vmatprep.subr.bf16.mxu1 %v2203_v0  ;;  %1565 = vmatprep.mubr.msk.bf16.mxu1 %vm2204_vm0, %v2203_v0  ;;  %v1742_v6 = vld [vmem:[#allocation8 + $0x8] sm:$0xff]   ;;  %v1737_v7 = vld [vmem:[#allocation7 + $0x20] sm:$0xff]   ;;  %v1743_v8 = vld [vmem:[#allocation8 + $0x10] sm:$0xff]   ;;  %s2718_s17 = sld [smem:[#allocation44_spill]] }
 0x122   :  { %1530 = vmatpush3.bf16.msra.mxu0 %v1733_v1  ;;  %1550 = vmatpush3.bf16.msra.mxu1 %v1741_v4  ;;  %v1738_v9 = vld [vmem:[#allocation7 + $0x28] sm:$0xff]   ;;  %v1744_v10 = vld [vmem:[#allocation8 + $0x18] sm:$0xff]   ;;  %v1739_v11 = vld [vmem:[#allocation7 + $0x30] sm:$0xff]  }
 0x123   :  { %1531 = vmatprep.subr.bf16.mxu0 %v2203_v0  ;;  %1551 = vmatprep.subr.bf16.mxu1 %v2203_v0  ;;  %v1745_v12 = vld [vmem:[#allocation8 + $0x20] sm:$0xff]   ;;  %v1740_v13 = vld [vmem:[#allocation7 + $0x38] sm:$0xff]   ;;  %v253_v15 = vld [vmem:[#allocation2 + $0x8] sm:$0xff] }
 0x124   :  { %v252_v14 = vld [vmem:[#allocation2] sm:$0xff]  ;;  %v1746_v17 = vld [vmem:[#allocation8 + $0x28] sm:$0xff]   ;;  %v1747_v18 = vld [vmem:[#allocation8 + $0x30] sm:$0xff]  }
 0x125   :  { %v271_v16 = vpack.c.bf16 %v253_v15, %v252_v14  ;;  %v1748_v19 = vld [vmem:[#allocation8 + $0x38] sm:$0xff]   ;;  %v1749_v20 = vld [vmem:[#allocation10] sm:$0xff]   ;;  %v1750_v21 = vld [vmem:[#allocation10 + $0x8] sm:$0xff]  }
 0x126   :  { %1532 = vmatpush3.bf16.msra.mxu0 %v1734_v2  ;;  %1552 = vmatpush3.bf16.msra.mxu1 %v1742_v6  ;;  %v1751_v22 = vld [vmem:[#allocation10 + $0x10] sm:$0xff]   ;;  %v1752_v23 = vld [vmem:[#allocation10 + $0x18] sm:$0xff]   ;;  %v1753_v24 = vld [vmem:[#allocation10 + $0x20] sm:$0xff]  }
 0x127   :  { %1533 = vmatprep.subr.bf16.mxu0 %v2203_v0  ;;  %1553 = vmatprep.subr.bf16.mxu1 %v2203_v0  ;;  %v1367_v25 = vld [vmem:[%s2716_s21] ss:$0 sm:$0xff]  ;;  %v1754_v37 = vld [vmem:[#allocation10 + $0x28] sm:$0xff]   ;;  %v1755_v38 = vld [vmem:[#allocation10 + $0x30] sm:$0xff]  }
 0x128   :  { %v1756_v39 = vld [vmem:[#allocation10 + $0x38] sm:$0xff]   ;;  %v1757_v40 = vld [vmem:[#allocation11] sm:$0xff]   ;;  %v1758_v41 = vld [vmem:[#allocation11 + $0x8] sm:$0xff]  }
 0x129   :  { %v1759_v42 = vld [vmem:[#allocation11 + $0x10] sm:$0xff]   ;;  %v1760_v43 = vld [vmem:[#allocation11 + $0x18] sm:$0xff]   ;;  %v1761_v44 = vld [vmem:[#allocation11 + $0x20] sm:$0xff]  }
 0x12a   :  { %1534 = vmatpush3.bf16.msra.mxu0 %v1735_v3  ;;  %1554 = vmatpush3.bf16.msra.mxu1 %v1743_v8  ;;  %v1762_v45 = vld [vmem:[#allocation11 + $0x28] sm:$0xff]   ;;  %v1376_v46 = vld [vmem:[%s2717_s26] ss:$0 sm:$0xff]  ;;  %v1763_v58 = vld [vmem:[#allocation11 + $0x30] sm:$0xff]  }
 0x12b   :  { %1535 = vmatprep.subr.bf16.mxu0 %v2203_v0  ;;  %1555 = vmatprep.subr.bf16.mxu1 %v2203_v0  ;;  %v1764_v59 = vld [vmem:[#allocation11 + $0x38] sm:$0xff]   ;;  %v1773_v60 = vld [vmem:[#allocation13] sm:$0xff]   ;;  %v1774_v61 = vld [vmem:[#allocation13 + $0x8] sm:$0xff]  }
 0x12c   :  { %v1775_v62 = vld [vmem:[#allocation13 + $0x10] sm:$0xff]   ;;  %v1776_v63 = vld [vmem:[#allocation13 + $0x18] sm:$0xff]   ;;  %v1777_v1 = vld [vmem:[#allocation13 + $0x20] sm:$0xff]  }
 0x12d   :  { %v1778_v2 = vld [vmem:[#allocation13 + $0x28] sm:$0xff]   ;;  %v1385_v3 = vld [vmem:[%s2682_s7] ss:$0 sm:$0xff] }
 0x12e   :  { %1536 = vmatpush3.bf16.msra.mxu0 %v1736_v5  ;;  %1556 = vmatpush3.bf16.msra.mxu1 %v1744_v10  ;;  %v1765_v14 = vld [vmem:[#allocation16] sm:$0xff]  }
 0x12f   :  { %1537 = vmatprep.subr.bf16.mxu0 %v2203_v0  ;;  %1557 = vmatprep.subr.bf16.mxu1 %v2203_v0 }
 0x132   :  { %1538 = vmatpush3.bf16.msra.mxu0 %v1737_v7  ;;  %1558 = vmatpush3.bf16.msra.mxu1 %v1745_v12 }
 0x133   :  { %1539 = vmatprep.subr.bf16.mxu0 %v2203_v0  ;;  %1559 = vmatprep.subr.bf16.mxu1 %v2203_v0 }
 0x136   :  { %1540 = vmatpush3.bf16.msra.mxu0 %v1738_v9  ;;  %1560 = vmatpush3.bf16.msra.mxu1 %v1746_v17  ;;  %v1767_v17 = vld [vmem:[#allocation16 + $0x10] sm:$0xff]  }
 0x137   :  { %1541 = vmatprep.subr.bf16.mxu0 %v2203_v0  ;;  %1561 = vmatprep.subr.bf16.mxu1 %v2203_v0 }
 0x13a   :  { %1542 = vmatpush3.bf16.msra.mxu0 %v1739_v11  ;;  %1562 = vmatpush3.bf16.msra.mxu1 %v1747_v18  ;;  %v1768_v18 = vld [vmem:[#allocation16 + $0x18] sm:$0xff]  }
 0x13b   :  { %1543 = vmatprep.subr.bf16.mxu0 %v2203_v0  ;;  %1563 = vmatprep.subr.bf16.mxu1 %v2203_v0 }
 0x13e   :  { %1544 = vmatpush3.bf16.msra.mxu0 %v1740_v13  ;;  %1564 = vmatpush3.bf16.msra.mxu1 %v1748_v19  ;;  %v1769_v19 = vld [vmem:[#allocation16 + $0x20] sm:$0xff]  }
 0x13f   :  { %1569 = vmatprep.subr.bf16.mxu0 %v2203_v0  ;;  %1589 = vmatprep.subr.bf16.mxu1 %v2203_v0 }
 0x141   :  { %1546 = vmatmul.mubr.bf16.vlgmr.msra.gmra.mrb[0].mxu0 %v271_v16  ;;  %v1766_v16 = vld [vmem:[#allocation16 + $0x8] sm:$0xff]  }
 0x142   :  { %1585 = vmatprep.mubr.msk.bf16.mxu0 %vm2204_vm0, %v2203_v0  ;;  %1570 = vmatpush3.bf16.msra.mxu0 %v1749_v20  ;;  %v1770_v20 = vld [vmem:[#allocation16 + $0x28] sm:$0xff]  }
 0x143   :  { %1571 = vmatprep.subr.bf16.mxu0 %v2203_v0 }
 0x146   :  { %1572 = vmatpush3.bf16.msra.mxu0 %v1750_v21  ;;  %v1771_v21 = vld [vmem:[#allocation16 + $0x30] sm:$0xff]  }
 0x147   :  { %1573 = vmatprep.subr.bf16.mxu0 %v2203_v0 }
 0x14a   :  { %1574 = vmatpush3.bf16.msra.mxu0 %v1751_v22  ;;  %v1772_v22 = vld [vmem:[#allocation16 + $0x38] sm:$0xff]  }
 0x14b   :  { %1575 = vmatprep.subr.bf16.mxu0 %v2203_v0 }
 0x14e   :  { %1576 = vmatpush3.bf16.msra.mxu0 %v1752_v23  ;;  %v837_v23 = vld [vmem:[#allocation5] sm:$0xff] }
 0x14f   :  { %1577 = vmatprep.subr.bf16.mxu0 %v2203_v0 }
 0x152   :  { %1578 = vmatpush3.bf16.msra.mxu0 %v1753_v24  ;;  %v838_v24 = vld [vmem:[#allocation5 + $0x8] sm:$0xff] }
 0x153   :  { %1579 = vmatprep.subr.bf16.mxu0 %v2203_v0 }
 0x156   :  { %1580 = vmatpush3.bf16.msra.mxu0 %v1754_v37 }
 0x157   :  { %1581 = vmatprep.subr.bf16.mxu0 %v2203_v0 }
 0x15a   :  { %1582 = vmatpush3.bf16.msra.mxu0 %v1755_v38 }
 0x15b   :  { %1583 = vmatprep.subr.bf16.mxu0 %v2203_v0 }
 0x15e   :  { %1584 = vmatpush3.bf16.msra.mxu0 %v1756_v39  ;;  %v1781_v39 = vld [vmem:[#allocation19] sm:$0xff]  }
 0x15f   :  { %1609 = vmatprep.subr.bf16.mxu0 %v2203_v0 }
 0x214   :  { %v360_v26 = vpop.f32.mrb[0].mxu0 }
 0x215   :  { %v361_v27 = vadd.f32 %v1367_v25, %v360_v26  ;;  %v1547_v28 = vpop.f32.mrb[1].mxu0  ;;  %v1779_v26 = vld [vmem:[#allocation13 + $0x30] sm:$0xff]  }
 0x216   :  { %v363_v29 = vpop.f32.mrb[2].mxu0  ;;  %v1394_v28 = vld [vmem:[%s2684_s9] ss:$0 sm:$0xff] }
 0x217   :  { %v367_v30 = vmul.f32 0.2, %v361_v27  ;;  %v364_v31 = vadd.f32 %v1367_v25, %v363_v29  ;;  %v1548_v32 = vpop.f32.mrb[3].mxu0  ;;  %v856_v25 = vpack.c.bf16 %v838_v24, %v837_v23 }
 0x219   :  { %v368_v33 = vmul.f32 0.2, %v364_v31  ;;  %v369_v34 = vmax.f32 %v361_v27, %v367_v30  ;;  %v1780_v27 = vld [vmem:[#allocation13 + $0x38] sm:$0xff]  }
 0x21b   :  { %v370_v35 = vmax.f32 %v364_v31, %v368_v33 }
 0x21d   :  { %v388_v36 = vpack.c.bf16 %v370_v35, %v369_v34 }
 0x21f   :  { %1566 = vmatmul.mubr.bf16.vlgmr.msra.gmra.mrb[0].mxu1 %v388_v36 }
 0x220   :  { %1605 = vmatprep.mubr.msk.bf16.mxu1 %vm2204_vm0, %v2203_v0  ;;  %1590 = vmatpush3.bf16.msra.mxu1 %v1757_v40 }
 0x221   :  { %1591 = vmatprep.subr.bf16.mxu1 %v2203_v0 }
 0x224   :  { %1592 = vmatpush3.bf16.msra.mxu1 %v1758_v41  ;;  %v1782_v41 = vld [vmem:[#allocation19 + $0x8] sm:$0xff]  }
 0x225   :  { %1593 = vmatprep.subr.bf16.mxu1 %v2203_v0 }
 0x228   :  { %1594 = vmatpush3.bf16.msra.mxu1 %v1759_v42  ;;  %v1783_v42 = vld [vmem:[#allocation19 + $0x10] sm:$0xff]  }
 0x229   :  { %1595 = vmatprep.subr.bf16.mxu1 %v2203_v0 }
 0x22c   :  { %1596 = vmatpush3.bf16.msra.mxu1 %v1760_v43  ;;  %v1784_v43 = vld [vmem:[#allocation19 + $0x18] sm:$0xff]  }
 0x22d   :  { %1597 = vmatprep.subr.bf16.mxu1 %v2203_v0 }
 0x230   :  { %1598 = vmatpush3.bf16.msra.mxu1 %v1761_v44  ;;  %v1785_v44 = vld [vmem:[#allocation19 + $0x20] sm:$0xff]  }
 0x231   :  { %1599 = vmatprep.subr.bf16.mxu1 %v2203_v0 }
 0x234   :  { %1600 = vmatpush3.bf16.msra.mxu1 %v1762_v45  ;;  %v1786_v45 = vld [vmem:[#allocation19 + $0x28] sm:$0xff]  }
 0x235   :  { %1601 = vmatprep.subr.bf16.mxu1 %v2203_v0 }
 0x238   :  { %1602 = vmatpush3.bf16.msra.mxu1 %v1763_v58 }
 0x239   :  { %1603 = vmatprep.subr.bf16.mxu1 %v2203_v0 }
 0x23c   :  { %1604 = vmatpush3.bf16.msra.mxu1 %v1764_v59 }
 0x23d   :  { %1629 = vmatprep.subr.bf16.mxu1 %v2203_v0 }
 0x2f2   :  { %v477_v47 = vpop.f32.mrb[0].mxu1 }
 0x2f3   :  { %v478_v48 = vadd.f32 %v1376_v46, %v477_v47  ;;  %v1567_v49 = vpop.f32.mrb[1].mxu1 }
 0x2f4   :  { %v480_v50 = vpop.f32.mrb[2].mxu1 }
 0x2f5   :  { %v484_v51 = vmul.f32 0.2, %v478_v48  ;;  %v481_v52 = vadd.f32 %v1376_v46, %v480_v50  ;;  %v1568_v53 = vpop.f32.mrb[3].mxu1  ;;  %v1412_v46 = vld [vmem:[#allocation17] ss:$0 sm:$0xff] }
 0x2f7   :  { %v485_v54 = vmul.f32 0.2, %v481_v52  ;;  %v486_v55 = vmax.f32 %v478_v48, %v484_v51  ;;  %v1787_v48 = vld [vmem:[#allocation19 + $0x30] sm:$0xff]  }
 0x2f9   :  { %v487_v56 = vmax.f32 %v481_v52, %v485_v54 }
 0x2fb   :  { %v505_v57 = vpack.c.bf16 %v487_v56, %v486_v55  ;;  %v1788_v55 = vld [vmem:[#allocation19 + $0x38] sm:$0xff]  }
 0x2fd   :  { %1586 = vmatmul.mubr.bf16.vlgmr.msra.gmra.mrb[4].mxu0 %v505_v57 }
 0x2fe   :  { %1625 = vmatprep.mubr.msk.bf16.mxu0 %vm2204_vm0, %v2203_v0  ;;  %1610 = vmatpush3.bf16.msra.mxu0 %v1773_v60  ;;  %v1789_v60 = vld [vmem:[#allocation22] sm:$0xff]  }
 0x2ff   :  { %1611 = vmatprep.subr.bf16.mxu0 %v2203_v0 }
 0x302   :  { %1612 = vmatpush3.bf16.msra.mxu0 %v1774_v61  ;;  %v1790_v61 = vld [vmem:[#allocation22 + $0x8] sm:$0xff]  }
 0x303   :  { %1613 = vmatprep.subr.bf16.mxu0 %v2203_v0 }
 0x306   :  { %1614 = vmatpush3.bf16.msra.mxu0 %v1775_v62  ;;  %v1791_v62 = vld [vmem:[#allocation22 + $0x10] sm:$0xff]  }
 0x307   :  { %1615 = vmatprep.subr.bf16.mxu0 %v2203_v0 }
 0x30a   :  { %1616 = vmatpush3.bf16.msra.mxu0 %v1776_v63  ;;  %v1792_v63 = vld [vmem:[#allocation22 + $0x18] sm:$0xff]  }
 0x30b   :  { %1617 = vmatprep.subr.bf16.mxu0 %v2203_v0 }
 0x30e   :  { %1618 = vmatpush3.bf16.msra.mxu0 %v1777_v1  ;;  %v1793_v1 = vld [vmem:[#allocation22 + $0x20] sm:$0xff]  }
 0x30f   :  { %1619 = vmatprep.subr.bf16.mxu0 %v2203_v0 }
 0x312   :  { %1620 = vmatpush3.bf16.msra.mxu0 %v1778_v2  ;;  %v1794_v2 = vld [vmem:[#allocation22 + $0x28] sm:$0xff]  }
 0x313   :  { %1621 = vmatprep.subr.bf16.mxu0 %v2203_v0 }
 0x316   :  { %1622 = vmatpush3.bf16.msra.mxu0 %v1779_v26 }
 0x317   :  { %1623 = vmatprep.subr.bf16.mxu0 %v2203_v0 }
 0x31a   :  { %1624 = vmatpush3.bf16.msra.mxu0 %v1780_v27 }
 0x31b   :  { %1649 = vmatprep.subr.bf16.mxu0 %v2203_v0 }
 0x3d0   :  { %v594_v4 = vpop.f32.mrb[4].mxu0 }
 0x3d1   :  { %v595_v5 = vadd.f32 %v1385_v3, %v594_v4  ;;  %v1587_v6 = vpop.f32.mrb[5].mxu0  ;;  %v1796_v4 = vld [vmem:[#allocation22 + $0x38] sm:$0xff]  }
 0x3d2   :  { %v597_v7 = vpop.f32.mrb[6].mxu0  ;;  %v1798_v6 = vld [vmem:[%s2693_s18 + $0x8] sm:$0xff]  }
 0x3d3   :  { %v601_v8 = vmul.f32 0.2, %v595_v5  ;;  %v598_v9 = vadd.f32 %v1385_v3, %v597_v7  ;;  %v1588_v10 = vpop.f32.mrb[7].mxu0  ;;  %v1795_v3 = vld [vmem:[#allocation22 + $0x30] sm:$0xff]  }
 0x3d4   :  { %v1799_v7 = vld [vmem:[%s2693_s18 + $0x10] sm:$0xff]   ;;  %v1403_v10 = vld [vmem:[#allocation14] ss:$0 sm:$0xff] }
 0x3d5   :  { %v602_v11 = vmul.f32 0.2, %v598_v9  ;;  %v603_v12 = vmax.f32 %v595_v5, %v601_v8  ;;  %v1797_v5 = vld [vmem:[%s2693_s18] sm:$0xff]   ;;  %v1800_v8 = vld [vmem:[%s2693_s18 + $0x18] sm:$0xff]  }
 0x3d7   :  { %v604_v13 = vmax.f32 %v598_v9, %v602_v11  ;;  %v1801_v9 = vld [vmem:[%s2693_s18 + $0x20] sm:$0xff]  }
 0x3d9   :  { %v622_v15 = vpack.c.bf16 %v604_v13, %v603_v12 }
 0x3db   :  { %1606 = vmatmul.mubr.bf16.vlgmr.msra.gmra.mrb[4].mxu1 %v622_v15 }
 0x3dc   :  { %1630 = vmatpush3.bf16.msra.mxu1 %v1765_v14  ;;  %1645 = vmatprep.mubr.msk.bf16.mxu1 %vm2204_vm0, %v2203_v0 }
 0x3dd   :  { %1631 = vmatprep.subr.bf16.mxu1 %v2203_v0 }
 0x3e0   :  { %1632 = vmatpush3.bf16.msra.mxu1 %v1766_v16 }
 0x3e1   :  { %1633 = vmatprep.subr.bf16.mxu1 %v2203_v0 }
 0x3e4   :  { %1634 = vmatpush3.bf16.msra.mxu1 %v1767_v17  ;;  %v1421_v17 = vld [vmem:[#allocation20] ss:$0 sm:$0xff] }
 0x3e5   :  { %1635 = vmatprep.subr.bf16.mxu1 %v2203_v0 }
 0x3e8   :  { %1636 = vmatpush3.bf16.msra.mxu1 %v1768_v18 }
 0x3e9   :  { %1637 = vmatprep.subr.bf16.mxu1 %v2203_v0 }
 0x3ec   :  { %1638 = vmatpush3.bf16.msra.mxu1 %v1769_v19 }
 0x3ed   :  { %1639 = vmatprep.subr.bf16.mxu1 %v2203_v0 }
 0x3f0   :  { %1640 = vmatpush3.bf16.msra.mxu1 %v1770_v20 }
 0x3f1   :  { %1641 = vmatprep.subr.bf16.mxu1 %v2203_v0 }
 0x3f4   :  { %1642 = vmatpush3.bf16.msra.mxu1 %v1771_v21 }
 0x3f5   :  { %1643 = vmatprep.subr.bf16.mxu1 %v2203_v0 }
 0x3f8   :  { %1644 = vmatpush3.bf16.msra.mxu1 %v1772_v22 }
 0x3f9   :  { %1669 = vmatprep.subr.bf16.mxu1 %v2203_v0 }
 0x3fb   :  { %1646 = vmatmul.mubr.bf16.vlgmr.msra.gmra.mrb[8].mxu1 %v856_v25 }
 0x3fc   :  { %1685 = vmatprep.mubr.msk.bf16.mxu1 %vm2204_vm0, %v2203_v0  ;;  %1670 = vmatpush3.bf16.msra.mxu1 %v1789_v60 }
 0x3fd   :  { %1671 = vmatprep.subr.bf16.mxu1 %v2203_v0 }
 0x400   :  { %1672 = vmatpush3.bf16.msra.mxu1 %v1790_v61 }
 0x401   :  { %1673 = vmatprep.subr.bf16.mxu1 %v2203_v0 }
 0x404   :  { %1674 = vmatpush3.bf16.msra.mxu1 %v1791_v62 }
 0x405   :  { %1675 = vmatprep.subr.bf16.mxu1 %v2203_v0 }
 0x408   :  { %1676 = vmatpush3.bf16.msra.mxu1 %v1792_v63 }
 0x409   :  { %1677 = vmatprep.subr.bf16.mxu1 %v2203_v0 }
 0x40c   :  { %1678 = vmatpush3.bf16.msra.mxu1 %v1793_v1 }
 0x40d   :  { %1679 = vmatprep.subr.bf16.mxu1 %v2203_v0 }
 0x410   :  { %1680 = vmatpush3.bf16.msra.mxu1 %v1794_v2 }
 0x411   :  { %1681 = vmatprep.subr.bf16.mxu1 %v2203_v0 }
 0x414   :  { %1682 = vmatpush3.bf16.msra.mxu1 %v1795_v3 }
 0x415   :  { %1683 = vmatprep.subr.bf16.mxu1 %v2203_v0 }
 0x418   :  { %1684 = vmatpush3.bf16.msra.mxu1 %v1796_v4 }
 0x4ae   :  { %v711_v29 = vpop.f32.mrb[4].mxu1 }
 0x4af   :  { %v712_v30 = vadd.f32 %v1394_v28, %v711_v29  ;;  %v1607_v31 = vpop.f32.mrb[5].mxu1  ;;  %v1802_v29 = vld [vmem:[%s2693_s18 + $0x28] sm:$0xff]  }
 0x4b0   :  { %v714_v32 = vpop.f32.mrb[6].mxu1  ;;  %v1804_v31 = vld [vmem:[%s2693_s18 + $0x38] sm:$0xff]  }
 0x4b1   :  { %v718_v33 = vmul.f32 0.2, %v712_v30  ;;  %v715_v34 = vadd.f32 %v1394_v28, %v714_v32  ;;  %v1608_v35 = vpop.f32.mrb[7].mxu1  ;;  %v1430_v32 = vld [vmem:[#allocation23] ss:$0 sm:$0xff] }
 0x4b3   :  { %v719_v36 = vmul.f32 0.2, %v715_v34  ;;  %v720_v37 = vmax.f32 %v712_v30, %v718_v33  ;;  %v1803_v30 = vld [vmem:[%s2693_s18 + $0x30] sm:$0xff]   ;;  %s2206_s18 = smov [#allocation25]  }
 0x4b4   :  { %s1332_s15 = sshll.u32 %s2206_s18, 4  ;;  %s1333_s15 = int_to_ptr.vmem [resolvable:$true] %s1332_s15 }
 0x4b5   :  { %v721_v38 = vmax.f32 %v715_v34, %v719_v36  ;;  %s2121_s21 = scalar_lea.vmem %s1333_s15, 256  ;;  %p2126_p1 = scmp.lt.s32.totalorder %s1333_s15, %s1333_s15 }
 0x4b6   :  { %p2122_p0 = scmp.ne.s32.totalorder %s1333_s15, %s2121_s21  ;;  %p2127_p2 = scmp.lt.s32.totalorder %s2121_s21, %s2121_s21 }
 0x4b7   :  { %v739_v40 = vpack.c.bf16 %v721_v38, %v720_v37 }
 0x4b8   :  { %p2128_p3 = por %p2127_p2, %p2126_p1 }
 0x4b9   :  { %1626 = vmatmul.mubr.bf16.vlgmr.msra.gmra.mrb[8].mxu0 %v739_v40 }
 0x4ba   :  { %1650 = vmatpush3.bf16.msra.mxu0 %v1781_v39  ;;  %1665 = vmatprep.mubr.msk.bf16.mxu0 %vm2204_vm0, %v2203_v0  ;;  %p2129_p4 = pnand %p2128_p3, %p2122_p0 }
 0x4bb   :  { %1651 = vmatprep.subr.bf16.mxu0 %v2203_v0 }
 0x4be   :  { %1652 = vmatpush3.bf16.msra.mxu0 %v1782_v41 }
 0x4bf   :  { %1653 = vmatprep.subr.bf16.mxu0 %v2203_v0 }
 0x4c2   :  { %1654 = vmatpush3.bf16.msra.mxu0 %v1783_v42 }
 0x4c3   :  { %1655 = vmatprep.subr.bf16.mxu0 %v2203_v0 }
 0x4c6   :  { %1656 = vmatpush3.bf16.msra.mxu0 %v1784_v43 }
 0x4c7   :  { %1657 = vmatprep.subr.bf16.mxu0 %v2203_v0 }
 0x4ca   :  { %1658 = vmatpush3.bf16.msra.mxu0 %v1785_v44  ;;  %v2205_v44 = vmov 0  }
 0x4cb   :  { %1659 = vmatprep.subr.bf16.mxu0 %v2203_v0  ;;  %1732 = vset.pattern.permute.xlu0 %v2205_v44 }
 0x4ce   :  { %v945_v47 = vpop.f32.mrb[8].mxu1  ;;  %1660 = vmatpush3.bf16.msra.mxu0 %v1786_v45 }
 0x4cf   :  { %v946_v49 = vadd.f32 %v1412_v46, %v945_v47  ;;  %v1647_v50 = vpop.f32.mrb[9].mxu1  ;;  %1661 = vmatprep.subr.bf16.mxu0 %v2203_v0 }
 0x4d0   :  { %v948_v51 = vpop.f32.mrb[10].mxu1 }
 0x4d1   :  { %v952_v52 = vmul.f32 0.2, %v946_v49  ;;  %v949_v53 = vadd.f32 %v1412_v46, %v948_v51  ;;  %v1648_v54 = vpop.f32.mrb[11].mxu1 }
 0x4d2   :  { %1662 = vmatpush3.bf16.msra.mxu0 %v1787_v48 }
 0x4d3   :  { %v953_v56 = vmul.f32 0.2, %v949_v53  ;;  %1663 = vmatprep.subr.bf16.mxu0 %v2203_v0  ;;  %v954_v57 = vmax.f32 %v946_v49, %v952_v52 }
 0x4d5   :  { %v955_v58 = vmax.f32 %v949_v53, %v953_v56 }
 0x4d6   :  { %1664 = vmatpush3.bf16.msra.mxu0 %v1788_v55 }
 0x4d7   :  { %v973_v59 = vpack.c.bf16 %v955_v58, %v954_v57  ;;  %1689 = vmatprep.subr.bf16.mxu0 %v2203_v0 }
 0x4d9   :  { %1666 = vmatmul.mubr.bf16.vlgmr.msra.gmra.mrb[12].mxu0 %v973_v59 }
 0x4da   :  { %1705 = vmatprep.mubr.msk.bf16.mxu0 %vm2204_vm0, %v2203_v0  ;;  %1690 = vmatpush3.bf16.msra.mxu0 %v1797_v5 }
 0x4db   :  { %1691 = vmatprep.subr.bf16.mxu0 %v2203_v0 }
 0x4de   :  { %1692 = vmatpush3.bf16.msra.mxu0 %v1798_v6 }
 0x4df   :  { %1693 = vmatprep.subr.bf16.mxu0 %v2203_v0 }
 0x4e2   :  { %1694 = vmatpush3.bf16.msra.mxu0 %v1799_v7 }
 0x4e3   :  { %1695 = vmatprep.subr.bf16.mxu0 %v2203_v0 }
 0x4e6   :  { %1696 = vmatpush3.bf16.msra.mxu0 %v1800_v8 }
 0x4e7   :  { %1697 = vmatprep.subr.bf16.mxu0 %v2203_v0 }
 0x4ea   :  { %1698 = vmatpush3.bf16.msra.mxu0 %v1801_v9 }
 0x4eb   :  { %1699 = vmatprep.subr.bf16.mxu0 %v2203_v0 }
 0x4ee   :  { %1700 = vmatpush3.bf16.msra.mxu0 %v1802_v29 }
 0x4ef   :  { %1701 = vmatprep.subr.bf16.mxu0 %v2203_v0 }
 0x4f2   :  { %1702 = vmatpush3.bf16.msra.mxu0 %v1803_v30 }
 0x4f3   :  { %1703 = vmatprep.subr.bf16.mxu0 %v2203_v0  ;;  %v1439_v0 = vld [vmem:[%s2718_s17] ss:$0 sm:$0xff] }
 0x4f6   :  { %1704 = vmatpush3.bf16.msra.mxu0 %v1804_v31 }
 0x58c   :  { %v828_v11 = vpop.f32.mrb[8].mxu0 }
 0x58d   :  { %v829_v12 = vadd.f32 %v1403_v10, %v828_v11  ;;  %v1627_v13 = vpop.f32.mrb[9].mxu0 }
 0x58e   :  { %v831_v14 = vpop.f32.mrb[10].mxu0 }
 0x58f   :  { %835 = vst [vmem:[#allocation25] sm:$0xff] %v829_v12  ;;  %v832_v15 = vadd.f32 %v1403_v10, %v831_v14  ;;  %v1628_v16 = vpop.f32.mrb[11].mxu0 }
 0x591   :  { %836 = vst [vmem:[#allocation25 + $0x8] sm:$0xff] %v832_v15 }
 0x5ac   :  { %v1062_v18 = vpop.f32.mrb[12].mxu0 }
 0x5ad   :  { %v1063_v19 = vadd.f32 %v1421_v17, %v1062_v18  ;;  %v1667_v20 = vpop.f32.mrb[13].mxu0 }
 0x5ae   :  { %v1065_v21 = vpop.f32.mrb[14].mxu0 }
 0x5af   :  { %v1069_v22 = vmul.f32 0.2, %v1063_v19  ;;  %v1066_v23 = vadd.f32 %v1421_v17, %v1065_v21  ;;  %v1668_v24 = vpop.f32.mrb[15].mxu0 }
 0x5b1   :  { %v1070_v25 = vmul.f32 0.2, %v1066_v23  ;;  %v1071_v26 = vmax.f32 %v1063_v19, %v1069_v22 }
 0x5b3   :  { %v1072_v27 = vmax.f32 %v1066_v23, %v1070_v25 }
 0x5b5   :  { %v1090_v28 = vpack.c.bf16 %v1072_v27, %v1071_v26 }
 0x5b7   :  { %1686 = vmatmul.mubr.bf16.vlgmr.msra.gmra.mrb[12].mxu1 %v1090_v28 }
 0x68a   :  { %v1179_v33 = vpop.f32.mrb[12].mxu1 }
 0x68b   :  { %v1180_v34 = vadd.f32 %v1430_v32, %v1179_v33  ;;  %v1687_v35 = vpop.f32.mrb[13].mxu1 }
 0x68c   :  { %v1182_v36 = vpop.f32.mrb[14].mxu1 }
 0x68d   :  { %v1186_v37 = vmul.f32 0.2, %v1180_v34  ;;  %v1183_v38 = vadd.f32 %v1430_v32, %v1182_v36  ;;  %v1688_v39 = vpop.f32.mrb[15].mxu1 }
 0x68f   :  { %v1187_v40 = vmul.f32 0.2, %v1183_v38  ;;  %v1188_v41 = vmax.f32 %v1180_v34, %v1186_v37 }
 0x691   :  { %v1189_v42 = vmax.f32 %v1183_v38, %v1187_v40 }
 0x693   :  { %v1207_v43 = vpack.c.bf16 %v1189_v42, %v1188_v41 }
 0x695   :  { %1706 = vmatmul.mubr.bf16.vlgmr.msra.gmra.mrb[16].mxu0 %v1207_v43 }
 0x768   :  { %v1296_v45 = vpop.f32.mrb[16].mxu0 }
 0x769   :  { %v1297_v46 = vadd.f32 %v1439_v0, %v1296_v45  ;;  %v1707_v47 = vpop.f32.mrb[17].mxu0 }
 0x76a   :  { %v1299_v48 = vpop.f32.mrb[18].mxu0 }
 0x76b   :  { %v1303_v49 = vsub.f32 0.0, %v1297_v46  ;;  %v1300_v50 = vadd.f32 %v1439_v0, %v1299_v48  ;;  %v1708_v51 = vpop.f32.mrb[19].mxu0 }
 0x76d   :  { %v1305_v52 = vmul.f32 1.442695, %v1303_v49  ;;  %v1304_v53 = vsub.f32 0.0, %v1300_v50 }
 0x76f   :  { %1805 = vpow2.f32 %v1305_v52  ;;  %v1307_v54 = vmul.f32 1.442695, %v1304_v53 }
 0x771   :  { %1807 = vpow2.f32 %v1307_v54 }
 0x779   :  { %v1806_v55 = vpop.eup %1805 }
 0x77a   :  { %v1309_v56 = vadd.f32 1.0, %v1806_v55 }
 0x77b   :  { %v1808_v57 = vpop.eup %1807 }
 0x77c   :  { %1809 = vrcp.f32 %v1309_v56  ;;  %v1310_v58 = vadd.f32 1.0, %v1808_v57 }
 0x77e   :  { %1811 = vrcp.f32 %v1310_v58 }
 0x786   :  { %v1810_v59 = vpop.eup %1809 }
 0x787   :  { %1315 = vperm.xlu0 %1732, %v1810_v59  }
 0x788   :  { %v1812_v60 = vpop.eup %1811 }
 0x78b   :  { %1320 = vperm.xlu0 %1732, %v1812_v60  }
 0x78c   :  { %2132 = shalt.err (!%p2129_p4)
}
 0x78d   :  { %s2719_s26 = sld [smem:[#allocation45_spill]] }
 0x793   :  { %s2133_s24 = scalar_lea.hbm %s2719_s26, 256 }
 0x794   :  { %p2134_p5 = scmp.ne.s32.totalorder %s2719_s26, %s2133_s24  ;;  %p2137_p6 = scmp.lt.u32.totalorder %s2133_s24, %s2719_s26 }
 0x796   :  { %p2139_p7 = pnand %p2137_p6, %p2134_p5 }
 0x798   :  { %2142 = shalt.err (!%p2139_p7)
}
 0x799   :  { %1338 = dma.vmem_to_hbm [thread:$0]  %s1333_s15, 256, %s2719_s26, [#allocation4], %s2186_s22, %s2186_s22, %s2187_s23  }
 0x79a   :  { %s2207_s14 = smov [#allocation26]  }
 0x79b   :  { %s1344_s2 = sshll.u32 %s2207_s14, 4  ;;  %s1345_s2 = int_to_ptr.vmem [resolvable:$true] %s1344_s2 }
 0x79c   :  { %s2143_s27 = scalar_lea.vmem %s1345_s2, 256  ;;  %p2148_p9 = scmp.lt.s32.totalorder %s1345_s2, %s1345_s2 }
 0x79d   :  { %p2144_p8 = scmp.ne.s32.totalorder %s1345_s2, %s2143_s27  ;;  %p2149_p10 = scmp.lt.s32.totalorder %s2143_s27, %s2143_s27 }
 0x79f   :  { %p2150_p11 = por %p2149_p10, %p2148_p9 }
 0x7a1   :  { %p2151_p12 = pnand %p2150_p11, %p2144_p8 }
 0x806   :  { %v1316_v61 = vpop.permute.xlu0 %1315 }
 0x807   :  { %v1323_v62 = vmul.f32 %v1316_v61, %v1297_v46 }
 0x809   :  { %1325 = vst [vmem:[#allocation26] sm:$0xff] %v1323_v62 }
 0x80a   :  { %v1321_v63 = vpop.permute.xlu0 %1320 }
 0x80b   :  { %v1324_v1 = vmul.f32 %v1321_v63, %v1300_v50 }
 0x80d   :  { %1326 = vst [vmem:[#allocation26 + $0x8] sm:$0xff] %v1324_v1 }
 0x80e   :  { %2154 = shalt.err (!%p2151_p12)
}
 0x80f   :  { %s2720_s6 = sld [smem:[#allocation46_spill]] }
 0x815   :  { %s2155_s19 = scalar_lea.hbm %s2720_s6, 256 }
 0x816   :  { %p2156_p13 = scmp.ne.s32.totalorder %s2720_s6, %s2155_s19  ;;  %p2159_p0 = scmp.lt.u32.totalorder %s2155_s19, %s2720_s6 }
 0x818   :  { %p2161_p1 = pnand %p2159_p0, %p2156_p13 }
 0x81a   :  { %2164 = shalt.err (!%p2161_p1)
}
 0x81b   :  { %1350 = dma.vmem_to_hbm [thread:$0]  %s1345_s2, 256, %s2720_s6, [#allocation27], %s2186_s22, %s2186_s22, %s2187_s23  }
 0x81c   :  { %2181 = dma.done.wait [#allocation4], 256  }
 0x81d   :  { %2182 = vsyncadd [#allocation4], 4294967040 }
 0x81e   :  { %2183 = dma.done.wait [#allocation27], 256  }
 0x81f   :  { %2184 = vsyncadd [#allocation27], 4294967040 }
 0x820   :  { %1357 = vsyncpa [#allocation3], 1 }
 0x821   :  { %1358 = vsyncpa [#allocation6], 1 }
 0x822   :  { %1359 = vsyncpa [#allocation9], 1 }
 0x823   :  { %1360 = vsyncpa [#allocation12], 1 }
 0x824   :  { %1361 = vsyncpa [#allocation15], 1 }
 0x825   :  { %1362 = vsyncpa [#allocation18], 1 }
 0x826   :  { %1363 = vsyncpa [#allocation21], 1 }
 0x827   :  { %1364 = vsyncpa [#allocation24], 1 }
 0x828   :  { %1365 = vsyncpa [#allocation4], 1 }
 0x829   :  { %1366 = vsyncpa [#allocation27], 1 }

</bundles_post_ra>
